<compile_context>
chip_gen: v7x
topology: tpu7x:2x2x1
jax: 0.10.0
libtpu: 0.0.40
codegen_flags: <defaults>
</compile_context>

<pallas_src>
import numpy as np
import jax
import jax.numpy as jnp
from jax import lax
from jax.experimental import pallas as pl
from jax.experimental.pallas import tpu as pltpu


# --------------------- host-side packing of the weights --------------------- #

def _block_diag_1x1(w_oihw, width):
    """(Cout, Cin, 1, 1) -> (width*Cin, width*Cout) block-diagonal matrix, so a 1x1
    conv over a row packed as [w0c0, w0c1, ..., w1c0, ...] is a single matmul."""
    cout, cin = w_oihw.shape[0], w_oihw.shape[1]
    w2 = np.asarray(w_oihw, np.float32)[:, :, 0, 0].T          # (Cin, Cout)
    out = np.zeros((width * cin, width * cout), np.float32)
    for v in range(width):
        out[v * cin:(v + 1) * cin, v * cout:(v + 1) * cout] = w2
    return out


def _banded_3x3(w_oihw, w_in, w_out, stride):
    """(Cout, Cin, 3, 3) -> (3, w_in*Cin, w_out*Cout).  Leading index = dy tap; the
    dx taps, the zero padding and the column stride are folded into the band."""
    cout, cin = w_oihw.shape[0], w_oihw.shape[1]
    wk = np.asarray(w_oihw, np.float32)
    out = np.zeros((3, w_in * cin, w_out * cout), np.float32)
    for dy in range(3):
        for j in range(w_out):
            for dx in range(3):
                w = j * stride + dx - 1
                if 0 <= w < w_in:
                    out[dy, w * cin:(w + 1) * cin, j * cout:(j + 1) * cout] = \
                        wk[:, :, dy, dx].T
    return out


def _sb_lanes(scale, bias, reps):
    """Per-channel folded-BN scale/bias -> per-lane vectors for the packed layout."""
    s = np.tile(np.asarray(scale, np.float32), reps)
    b = np.tile(np.asarray(bias, np.float32), reps)
    return np.stack([s, b], axis=0)                            # (2, reps*C)


def pack_inception_b_params(params, H, W, compute_dtype=jnp.bfloat16):
    (w1, s1, c1b) = params["b1x1_1"]
    (w2, s2, c2b) = params["b1x1_2"]
    (w3, s3, c3b) = params["b3x3_1"]
    (w4, s4, c4b) = params["b3x3_2"]
    (w5, s5, c5b) = params["b3x3_3"]
    Cin = w1.shape[1]
    C1, C2, C3, C4, C5 = (w1.shape[0], w2.shape[0], w3.shape[0],
                          w4.shape[0], w5.shape[0])
    Wout = W // 2

    bd13 = np.concatenate([_block_diag_1x1(w1, W), _block_diag_1x1(w3, W)], axis=1)
    sb13 = np.concatenate([_sb_lanes(s1, c1b, W), _sb_lanes(s3, c3b, W)], axis=1)

    cd = compute_dtype
    return dict(
        bd13=jnp.asarray(bd13, cd),
        sb13=jnp.asarray(sb13, jnp.float32),
        b2w=jnp.asarray(_banded_3x3(w2, W, Wout, 2), cd),
        sb2=jnp.asarray(_sb_lanes(s2, c2b, Wout), jnp.float32),
        bw4=jnp.asarray(_banded_3x3(w4, W, W, 1), cd),
        sb4=jnp.asarray(_sb_lanes(s4, c4b, W), jnp.float32),
        b2w5=jnp.asarray(_banded_3x3(w5, W, Wout, 2), cd),
        sb5=jnp.asarray(_sb_lanes(s5, c5b, Wout), jnp.float32),
        dims=dict(Cin=Cin, C1=C1, C2=C2, C3=C3, C4=C4, C5=C5, H=H, W=W),
    )


# ------------------------------- forward ------------------------------------ #

def inception_b_forward(x_nchw, packed, *, target_m_rows=256):
    d = packed["dims"]
    N, Cin, H, W = x_nchw.shape
    assert (Cin, H, W) == (d["Cin"], d["H"], d["W"])
    assert H % 2 == 0 and W % 2 == 0, "even spatial dims expected for this block"
    H2, Wout = H // 2, W // 2
    C1, C2, C3, C4, C5 = d["C1"], d["C2"], d["C3"], d["C4"], d["C5"]

    WC = W * Cin                     # packed input row width (lanes)
    L1 = W * C1                      # branch3x3 1x1 slice inside the fused 1x1 out
    LD = W * C3                      # branch3x3dbl 1x1 slice
    OA, OD = Wout * C2, Wout * C5    # conv-branch output slabs (stride-2 folded)
    OPF = W * Cin                    # pool slab stored at full W; host subsamples
    OT = OA + OD + OPF
    OTP = ((OT + 127) // 128) * 128  # lane-dense (multiple-of-128) store width

    # Batch folding: NB images per grid step -> M = NB*H rows per MXU pass.
    NB = max(1, min(N, target_m_rows // H))
    while N % NB:
        NB -= 1
    G = N // NB
    NBH2 = NB * H2

    # NCHW -> row-packed rows (lanes = W*Cin), split by row parity.  Each half is a
    # single fused XLA gather of x; the kernel reads the activation exactly once.
    x_rows = jnp.transpose(x_nchw, (0, 2, 3, 1)).reshape(N, H, WC)
    x_e = x_rows[:, 0::2, :].reshape(N * H2, WC)      # even image rows, image-major
    x_o = x_rows[:, 1::2, :].reshape(N * H2, WC)      # odd  image rows, image-major

    def kernel(xe_ref, xo_ref, bd13_ref, sb13_ref, b2w_ref, sb2_ref,
               bw4_ref, sb4_ref, b2w5_ref, sb5_ref, out_ref):
        cdt = bd13_ref.dtype                         # bf16 (default) or f32
        neg_inf = jnp.float32(-jnp.inf)

        def mm(a, w):                                # MXU matmul, f32 accumulate
            return jnp.dot(a.astype(w.dtype), w, preferred_element_type=jnp.float32)

        def bn_relu(y, sb):                          # folded BatchNorm + ReLU, f32
            return jnp.maximum(y * sb[0:1, :] + sb[1:2, :], 0.0)

        # Per-image row masks so the dy shifts never bleed across folded images.
        row_in_img = lax.broadcasted_iota(jnp.int32, (NBH2, 1), 0) % H2
        is_first = row_in_img == 0
        is_last = row_in_img == (H2 - 1)

        def shift_down(m, fill=0.0):                 # y[i] = m[i-1] within an image
            top = jnp.full((1, m.shape[1]), fill, m.dtype)
            y = jnp.concatenate([top, m[:-1, :]], axis=0)
            return jnp.where(is_first, fill, y)

        def shift_up(m, fill=0.0):                   # y[i] = m[i+1] within an image
            bot = jnp.full((1, m.shape[1]), fill, m.dtype)
            y = jnp.concatenate([m[1:, :], bot], axis=0)
            return jnp.where(is_last, fill, y)

        xe = xe_ref[...]                             # (NB*H2, W*Cin) f32
        xo = xo_ref[...]
        x_cat = jnp.concatenate([xe, xo], axis=0)    # rows: [even | odd], image-major

        # ---- both 1x1 conv heads fused into one MXU matmul (M = NB*H rows) ----
        u = bn_relu(mm(x_cat, bd13_ref[...]), sb13_ref[...])    # (2*NBH2, W*(C1+C3))
        a1e = u[:NBH2, :L1].astype(cdt)              # branch3x3 1x1 out (even rows)
        a1o = u[NBH2:, :L1].astype(cdt)              #                   (odd rows)
        d1 = u[:, L1:].astype(cdt)                   # branch3x3dbl 1x1 out (all rows)

        # ---- branch3x3: 3x3 / stride 2 / pad 1 (row parity + banded W weights) ----
        a2 = bn_relu(mm(a1e, b2w_ref[1]) + mm(a1o, b2w_ref[2])
                     + shift_down(mm(a1o, b2w_ref[0])), sb2_ref[...])   # (NBH2, OA)

        # ---- branch3x3dbl: 3x3 / stride 1 / pad 1 ----
        v0 = mm(d1, bw4_ref[0])
        v1 = mm(d1, bw4_ref[1])
        v2 = mm(d1, bw4_ref[2])                      # (2*NBH2, W*C4), rows [even|odd]
        d2e = bn_relu(shift_down(v0[NBH2:]) + v1[:NBH2] + v2[NBH2:], sb4_ref[...])
        d2o = bn_relu(v0[:NBH2] + v1[NBH2:] + shift_up(v2[:NBH2]), sb4_ref[...])
        d2e = d2e.astype(cdt)
        d2o = d2o.astype(cdt)

        # ---- branch3x3dbl: 3x3 / stride 2 / pad 1 ----
        d3 = bn_relu(mm(d2e, b2w5_ref[1]) + mm(d2o, b2w5_ref[2])
                     + shift_down(mm(d2o, b2w5_ref[0])), sb5_ref[...])  # (NBH2, OD)

        # ---- branch_pool: 3x3 / stride 2 / pad 1 max pool, pure VPU/XLU ----
        # Column taps w-1 / w+1 are lane rolls by +/-Cin; lanes of column 0 are
        # masked to -inf for the w-1 tap (zero-pad column).  The column-max is kept
        # at full W; the wrapper takes the even columns (stride-2 subsample).
        lane = lax.broadcasted_iota(jnp.int32, (2 * NBH2, WC), 1)
        left = jnp.where(lane < Cin, neg_inf, pltpu.roll(x_cat, Cin, axis=1))
        right = pltpu.roll(x_cat, WC - Cin, axis=1)  # wrap lands on odd cols (dropped)
        cand = jnp.maximum(jnp.maximum(left, x_cat), right)     # (2*NBH2, W*Cin)
        cand_e, cand_o = cand[:NBH2], cand[NBH2:]
        pool = jnp.maximum(jnp.maximum(cand_e, cand_o),
                           shift_down(cand_o, neg_inf))         # (NBH2, W*Cin)

        # ---- fused channel concat: ONE lane-dense store per grid step ----
        parts = [a2, d3, pool]
        if OTP > OT:
            parts.append(jnp.zeros((NBH2, OTP - OT), jnp.float32))
        out_ref[...] = jnp.concatenate(parts, axis=1).astype(out_ref.dtype)

    weight_args = (packed["bd13"], packed["sb13"], packed["b2w"], packed["sb2"],
                   packed["bw4"], packed["sb4"], packed["b2w5"], packed["sb5"])

    flops = (2 * N * H * WC * (L1 + LD)
             + 2 * 3 * N * H2 * L1 * OA
             + 2 * 3 * N * H * LD * (W * C4)
             + 2 * 3 * N * H2 * (W * C4) * OD)
    bytes_accessed = int(4 * (x_e.size + x_o.size + N * H2 * OTP)
                         + sum(int(a.size) * a.dtype.itemsize for a in weight_args))

    out = pl.pallas_call(
        kernel,
        out_shape=jax.ShapeDtypeStruct((N * H2, OTP), jnp.float32),
        grid_spec=pltpu.PrefetchScalarGridSpec(
            num_scalar_prefetch=0,
            grid=(G,),
            in_specs=[
                pl.BlockSpec((NBH2, WC), lambda n: (n, 0)),
                pl.BlockSpec((NBH2, WC), lambda n: (n, 0)),
                pl.BlockSpec(packed["bd13"].shape, lambda n: (0, 0)),
                pl.BlockSpec(packed["sb13"].shape, lambda n: (0, 0)),
                pl.BlockSpec(packed["b2w"].shape, lambda n: (0, 0, 0)),
                pl.BlockSpec(packed["sb2"].shape, lambda n: (0, 0)),
                pl.BlockSpec(packed["bw4"].shape, lambda n: (0, 0, 0)),
                pl.BlockSpec(packed["sb4"].shape, lambda n: (0, 0)),
                pl.BlockSpec(packed["b2w5"].shape, lambda n: (0, 0, 0)),
                pl.BlockSpec(packed["sb5"].shape, lambda n: (0, 0)),
            ],
            out_specs=pl.BlockSpec((NBH2, OTP), lambda n: (n, 0)),
        ),
        compiler_params=pltpu.CompilerParams(
            dimension_semantics=("parallel",),
            vmem_limit_bytes=32 * 1024 * 1024,
        ),
        cost_estimate=pl.CostEstimate(flops=flops, transcendentals=0,
                                      bytes_accessed=bytes_accessed),
    )(x_e, x_o, *weight_args)

    # Unpack the lane-packed (w, c) layout back to NCHW for the caller.
    out3 = out.reshape(N, H2, OTP)
    a2 = out3[:, :, 0:OA].reshape(N, H2, Wout, C2)
    d3 = out3[:, :, OA:OA + OD].reshape(N, H2, Wout, C5)
    pp = out3[:, :, OA + OD:OA + OD + OPF].reshape(N, H2, W, Cin)[:, :, 0::2, :]
    y = jnp.concatenate([a2, d3, pp], axis=-1)
    return jnp.transpose(y, (0, 3, 1, 2))


# ------------------------------ parameters ---------------------------------- #

def _make_basic_conv_params(key, cin, cout, ksize, eps=1e-3):
    kw_, kg, kb, km, kv = jax.random.split(key, 5)
    w = jax.random.normal(kw_, (cout, cin, ksize, ksize), jnp.float32) * 0.1
    gamma = jax.random.uniform(kg, (cout,), jnp.float32, 0.5, 1.5)
    beta = jax.random.normal(kb, (cout,), jnp.float32) * 0.1
    mean = jax.random.normal(km, (cout,), jnp.float32) * 0.1
    var = jax.random.uniform(kv, (cout,), jnp.float32, 0.5, 1.5)
    scale = gamma / jnp.sqrt(var + eps)     # BatchNorm (eval mode) folded to affine
    bias = beta - mean * scale
    return (w, scale, bias)


def make_inception_b_params(key, in_channels, b_1x1_1, b_1x1_2, b_3x3_1, b_3x3_2, b_3x3_3):
    ks = jax.random.split(key, 5)
    return {
        "b1x1_1": _make_basic_conv_params(ks[0], in_channels, b_1x1_1, 1),
        "b1x1_2": _make_basic_conv_params(ks[1], b_1x1_1, b_1x1_2, 3),
        "b3x3_1": _make_basic_conv_params(ks[2], in_channels, b_3x3_1, 1),
        "b3x3_2": _make_basic_conv_params(ks[3], b_3x3_1, b_3x3_2, 3),
        "b3x3_3": _make_basic_conv_params(ks[4], b_3x3_2, b_3x3_3, 3),
    }


# ----------------------------- pure-JAX reference ---------------------------- #

def _ref_basic_conv(x_nchw, w, scale, bias, stride, padding):
    y = lax.conv_general_dilated(
        x_nchw, w, window_strides=(stride, stride),
        padding=((padding, padding), (padding, padding)),
        dimension_numbers=("NCHW", "OIHW", "NCHW"),
        precision=lax.Precision.HIGHEST)
    y = y * scale[None, :, None, None] + bias[None, :, None, None]
    return jnp.maximum(y, 0.0)


def _ref_forward(x, params):
    b = _ref_basic_conv(x, *params["b1x1_1"], 1, 0)
    b = _ref_basic_conv(b, *params["b1x1_2"], 2, 1)
    d = _ref_basic_conv(x, *params["b3x3_1"], 1, 0)
    d = _ref_basic_conv(d, *params["b3x3_2"], 1, 1)
    d = _ref_basic_conv(d, *params["b3x3_3"], 2, 1)
    p = lax.reduce_window(x, -jnp.inf, lax.max, (1, 1, 3, 3), (1, 1, 2, 2),
                          ((0, 0), (0, 0), (1, 1), (1, 1)))
    return jnp.concatenate([b, d, p], axis=1)


# --------------------------------- main -------------------------------------- #

if __name__ == "__main__":
    key = jax.random.PRNGKey(0)
    kx, kp = jax.random.split(key)

    N, Cin, H, W = 2, 4, 16, 16
    b_1x1_1, b_1x1_2, b_3x3_1, b_3x3_2, b_3x3_3 = 8, 8, 8, 8, 8

    x = jax.random.normal(kx, (N, Cin, H, W), jnp.float32)
    params = make_inception_b_params(kp, Cin, b_1x1_1, b_1x1_2, b_3x3_1, b_3x3_2,
                                     b_3x3_3)
    ref = jax.block_until_ready(_ref_forward(x, params))
    expected_shape = (N, b_1x1_2 + b_3x3_3 + Cin, H // 2, W // 2)

    # f32-MXU variant: tight validation of the packed-conv / pool / concat logic.
    packed_f32 = pack_inception_b_params(params, H, W, compute_dtype=jnp.float32)
    out_f32 = jax.block_until_ready(inception_b_forward(x, packed_f32))
    assert out_f32.shape == expected_shape, (out_f32.shape, expected_shape)
    err_f32 = float(jnp.max(jnp.abs(out_f32 - ref)))
    assert jnp.allclose(out_f32, ref, atol=1e-3, rtol=1e-3), err_f32

    # bf16-MXU variant (default fast path on v6e/v7x): bf16 operands, f32
    # accumulation + f32 BN/ReLU epilogue; pool branch is exact f32 (no matmul).
    packed_bf16 = pack_inception_b_params(params, H, W, compute_dtype=jnp.bfloat16)
    out_bf16 = jax.block_until_ready(inception_b_forward(x, packed_bf16))
    assert out_bf16.shape == expected_shape, (out_bf16.shape, expected_shape)
    err_bf16 = float(jnp.max(jnp.abs(out_bf16 - ref)))
    assert jnp.allclose(out_bf16, ref, atol=5e-2, rtol=5e-2), err_bf16

    print("KERNEL_OK")
</pallas_src>

<mosaic_0001>
module attributes {stable_mosaic.version = 11 : i64} {
  func.func @kernel(%arg0: i32, %arg1: memref<16x64xf32, #tpu.memory_space<vmem>>, %arg2: memref<16x64xf32, #tpu.memory_space<vmem>>, %arg3: memref<64x256xf32, #tpu.memory_space<vmem>>, %arg4: memref<2x256xf32, #tpu.memory_space<vmem>>, %arg5: memref<3x128x64xf32, #tpu.memory_space<vmem>>, %arg6: memref<2x64xf32, #tpu.memory_space<vmem>>, %arg7: memref<3x128x128xf32, #tpu.memory_space<vmem>>, %arg8: memref<2x128xf32, #tpu.memory_space<vmem>>, %arg9: memref<3x128x64xf32, #tpu.memory_space<vmem>>, %arg10: memref<2x64xf32, #tpu.memory_space<vmem>>, %arg11: memref<16x256xf32, #tpu.memory_space<vmem>>) attributes {dimension_semantics = [#tpu.dimension_semantics<parallel>], iteration_bounds = array<i64: 1>, scalar_prefetch = 0 : i64, scratch_operands = 0 : i64, tpu.core_type = #tpu.core_type<tc>, window_params = [{transform_indices = @transform_0, window_bounds = array<i64: 16, 64>}, {transform_indices = @transform_1, window_bounds = array<i64: 16, 64>}, {pipeline_mode = #tpu.pipeline_mode<synchronous>, transform_indices = @transform_2, window_bounds = array<i64: 64, 256>}, {pipeline_mode = #tpu.pipeline_mode<synchronous>, transform_indices = @transform_3, window_bounds = array<i64: 2, 256>}, {pipeline_mode = #tpu.pipeline_mode<synchronous>, transform_indices = @transform_4, window_bounds = array<i64: 3, 128, 64>}, {pipeline_mode = #tpu.pipeline_mode<synchronous>, transform_indices = @transform_5, window_bounds = array<i64: 2, 64>}, {pipeline_mode = #tpu.pipeline_mode<synchronous>, transform_indices = @transform_6, window_bounds = array<i64: 3, 128, 128>}, {pipeline_mode = #tpu.pipeline_mode<synchronous>, transform_indices = @transform_7, window_bounds = array<i64: 2, 128>}, {pipeline_mode = #tpu.pipeline_mode<synchronous>, transform_indices = @transform_8, window_bounds = array<i64: 3, 128, 64>}, {pipeline_mode = #tpu.pipeline_mode<synchronous>, transform_indices = @transform_9, window_bounds = array<i64: 2, 64>}, {transform_indices = @transform_10, window_bounds = array<i64: 16, 256>}]} {
    %0 = tpu.iota {dimensions = array<i32: 0>} : vector<16x1xi32>
    %c8_i32 = arith.constant 8 : i32
    %c0_i32 = arith.constant 0 : i32
    %1 = arith.cmpi eq, %c8_i32, %c0_i32 : i32
    %c1_i32 = arith.constant 1 : i32
    %2 = arith.select %1, %c1_i32, %c8_i32 : i32
    %3 = vector.broadcast %2 : i32 to vector<16x1xi32>
    %4 = arith.remsi %0, %3 : vector<16x1xi32>
    %c0_i32_0 = arith.constant 0 : i32
    %5 = vector.broadcast %c0_i32_0 : i32 to vector<16x1xi32>
    %6 = arith.cmpi ne, %4, %5 : vector<16x1xi32>
    %c0_i32_1 = arith.constant 0 : i32
    %7 = vector.broadcast %c0_i32_1 : i32 to vector<16x1xi32>
    %8 = arith.cmpi slt, %4, %7 : vector<16x1xi32>
    %c0_i32_2 = arith.constant 0 : i32
    %9 = arith.cmpi slt, %2, %c0_i32_2 : i32
    %10 = vector.broadcast %9 : i1 to vector<16x1xi1>
    %11 = vector.broadcast %10 : vector<16x1xi1> to vector<16x1xi1>
    %12 = arith.xori %8, %11 : vector<16x1xi1>
    %13 = arith.andi %12, %6 : vector<16x1xi1>
    %14 = vector.broadcast %2 : i32 to vector<16x1xi32>
    %15 = arith.addi %4, %14 : vector<16x1xi32>
    %16 = arith.select %13, %15, %4 : vector<16x1xi1>, vector<16x1xi32>
    %c0_i32_3 = arith.constant 0 : i32
    %17 = vector.broadcast %c0_i32_3 : i32 to vector<16x1xi32>
    %18 = arith.cmpi eq, %16, %17 : vector<16x1xi32>
    %c7_i32 = arith.constant 7 : i32
    %19 = vector.broadcast %c7_i32 : i32 to vector<16x1xi32>
    %20 = arith.cmpi eq, %16, %19 : vector<16x1xi32>
    %c0 = arith.constant 0 : index
    %c0_4 = arith.constant 0 : index
    %21 = vector.load %arg1[%c0, %c0_4] : memref<16x64xf32, #tpu.memory_space<vmem>>, vector<16x64xf32>
    %c0_5 = arith.constant 0 : index
    %c0_6 = arith.constant 0 : index
    %22 = vector.load %arg2[%c0_5, %c0_6] : memref<16x64xf32, #tpu.memory_space<vmem>>, vector<16x64xf32>
    %23 = tpu.concatenate %21, %22 in 0 : vector<16x64xf32>, vector<16x64xf32> -> vector<32x64xf32>
    %c0_7 = arith.constant 0 : index
    %c0_8 = arith.constant 0 : index
    %24 = vector.load %arg3[%c0_7, %c0_8] : memref<64x256xf32, #tpu.memory_space<vmem>>, vector<64x256xf32>
    %cst = arith.constant dense<0.000000e+00> : vector<32x256xf32>
    %25 = tpu.matmul %23, %24, %cst {dimension_numbers = #tpu.dot_dimension_numbers<[1], [0], [0], [1], [0, 0, 1, 1], [], []>} : vector<32x64xf32>, vector<64x256xf32>, vector<32x256xf32> -> vector<32x256xf32>
    %c0_9 = arith.constant 0 : index
    %c0_10 = arith.constant 0 : index
    %26 = vector.load %arg4[%c0_9, %c0_10] : memref<2x256xf32, #tpu.memory_space<vmem>>, vector<2x256xf32>
    %27 = vector.extract_strided_slice %26 {offsets = [0, 0], sizes = [1, 256], strides = [1, 1]} : vector<2x256xf32> to vector<1x256xf32>
    %28 = vector.broadcast %27 : vector<1x256xf32> to vector<32x256xf32>
    %29 = arith.mulf %25, %28 : vector<32x256xf32>
    %30 = vector.extract_strided_slice %26 {offsets = [1, 0], sizes = [1, 256], strides = [1, 1]} : vector<2x256xf32> to vector<1x256xf32>
    %31 = vector.broadcast %30 : vector<1x256xf32> to vector<32x256xf32>
    %32 = arith.addf %29, %31 : vector<32x256xf32>
    %cst_11 = arith.constant 0.000000e+00 : f32
    %33 = vector.broadcast %cst_11 : f32 to vector<32x256xf32>
    %34 = arith.maximumf %32, %33 : vector<32x256xf32>
    %35 = vector.extract_strided_slice %34 {offsets = [0, 0], sizes = [16, 128], strides = [1, 1]} : vector<32x256xf32> to vector<16x128xf32>
    %36 = vector.extract_strided_slice %34 {offsets = [16, 0], sizes = [16, 128], strides = [1, 1]} : vector<32x256xf32> to vector<16x128xf32>
    %37 = vector.extract_strided_slice %34 {offsets = [0, 128], sizes = [32, 128], strides = [1, 1]} : vector<32x256xf32> to vector<32x128xf32>
    %c1 = arith.constant 1 : index
    %c0_12 = arith.constant 0 : index
    %c0_13 = arith.constant 0 : index
    %38 = vector.load %arg5[%c1, %c0_12, %c0_13] : memref<3x128x64xf32, #tpu.memory_space<vmem>>, vector<1x128x64xf32>
    %39 = vector.shape_cast %38 : vector<1x128x64xf32> to vector<128x64xf32>
    %cst_14 = arith.constant dense<0.000000e+00> : vector<16x64xf32>
    %40 = tpu.matmul %35, %39, %cst_14 {dimension_numbers = #tpu.dot_dimension_numbers<[1], [0], [0], [1], [0, 0, 1, 1], [], []>} : vector<16x128xf32>, vector<128x64xf32>, vector<16x64xf32> -> vector<16x64xf32>
    %c2 = arith.constant 2 : index
    %c0_15 = arith.constant 0 : index
    %c0_16 = arith.constant 0 : index
    %41 = vector.load %arg5[%c2, %c0_15, %c0_16] : memref<3x128x64xf32, #tpu.memory_space<vmem>>, vector<1x128x64xf32>
    %42 = vector.shape_cast %41 : vector<1x128x64xf32> to vector<128x64xf32>
    %cst_17 = arith.constant dense<0.000000e+00> : vector<16x64xf32>
    %43 = tpu.matmul %36, %42, %cst_17 {dimension_numbers = #tpu.dot_dimension_numbers<[1], [0], [0], [1], [0, 0, 1, 1], [], []>} : vector<16x128xf32>, vector<128x64xf32>, vector<16x64xf32> -> vector<16x64xf32>
    %44 = arith.addf %40, %43 : vector<16x64xf32>
    %c0_18 = arith.constant 0 : index
    %c0_19 = arith.constant 0 : index
    %c0_20 = arith.constant 0 : index
    %45 = vector.load %arg5[%c0_18, %c0_19, %c0_20] : memref<3x128x64xf32, #tpu.memory_space<vmem>>, vector<1x128x64xf32>
    %46 = vector.shape_cast %45 : vector<1x128x64xf32> to vector<128x64xf32>
    %cst_21 = arith.constant dense<0.000000e+00> : vector<16x64xf32>
    %47 = tpu.matmul %36, %46, %cst_21 {dimension_numbers = #tpu.dot_dimension_numbers<[1], [0], [0], [1], [0, 0, 1, 1], [], []>} : vector<16x128xf32>, vector<128x64xf32>, vector<16x64xf32> -> vector<16x64xf32>
    %cst_22 = arith.constant 0.000000e+00 : f32
    %48 = vector.broadcast %cst_22 : f32 to vector<1x64xf32>
    %49 = vector.extract_strided_slice %47 {offsets = [0, 0], sizes = [15, 64], strides = [1, 1]} : vector<16x64xf32> to vector<15x64xf32>
    %50 = tpu.concatenate %48, %49 in 0 : vector<1x64xf32>, vector<15x64xf32> -> vector<16x64xf32>
    %cst_23 = arith.constant 0.000000e+00 : f32
    %51 = vector.shape_cast %18 : vector<16x1xi1> to vector<16x1xi1>
    %52 = vector.broadcast %51 : vector<16x1xi1> to vector<16x64xi1>
    %53 = vector.broadcast %cst_23 : f32 to vector<16x64xf32>
    %54 = arith.select %52, %53, %50 : vector<16x64xi1>, vector<16x64xf32>
    %55 = arith.addf %44, %54 : vector<16x64xf32>
    %c0_24 = arith.constant 0 : index
    %c0_25 = arith.constant 0 : index
    %56 = vector.load %arg6[%c0_24, %c0_25] : memref<2x64xf32, #tpu.memory_space<vmem>>, vector<2x64xf32>
    %57 = vector.extract_strided_slice %56 {offsets = [0, 0], sizes = [1, 64], strides = [1, 1]} : vector<2x64xf32> to vector<1x64xf32>
    %58 = vector.broadcast %57 : vector<1x64xf32> to vector<16x64xf32>
    %59 = arith.mulf %55, %58 : vector<16x64xf32>
    %60 = vector.extract_strided_slice %56 {offsets = [1, 0], sizes = [1, 64], strides = [1, 1]} : vector<2x64xf32> to vector<1x64xf32>
    %61 = vector.broadcast %60 : vector<1x64xf32> to vector<16x64xf32>
    %62 = arith.addf %59, %61 : vector<16x64xf32>
    %cst_26 = arith.constant 0.000000e+00 : f32
    %63 = vector.broadcast %cst_26 : f32 to vector<16x64xf32>
    %64 = arith.maximumf %62, %63 : vector<16x64xf32>
    %c0_27 = arith.constant 0 : index
    %c0_28 = arith.constant 0 : index
    %c0_29 = arith.constant 0 : index
    %65 = vector.load %arg7[%c0_27, %c0_28, %c0_29] : memref<3x128x128xf32, #tpu.memory_space<vmem>>, vector<1x128x128xf32>
    %66 = vector.shape_cast %65 : vector<1x128x128xf32> to vector<128x128xf32>
    %cst_30 = arith.constant dense<0.000000e+00> : vector<32x128xf32>
    %67 = tpu.matmul %37, %66, %cst_30 {dimension_numbers = #tpu.dot_dimension_numbers<[1], [0], [0], [1], [0, 0, 1, 1], [], []>} : vector<32x128xf32>, vector<128x128xf32>, vector<32x128xf32> -> vector<32x128xf32>
    %c1_31 = arith.constant 1 : index
    %c0_32 = arith.constant 0 : index
    %c0_33 = arith.constant 0 : index
    %68 = vector.load %arg7[%c1_31, %c0_32, %c0_33] : memref<3x128x128xf32, #tpu.memory_space<vmem>>, vector<1x128x128xf32>
    %69 = vector.shape_cast %68 : vector<1x128x128xf32> to vector<128x128xf32>
    %cst_34 = arith.constant dense<0.000000e+00> : vector<32x128xf32>
    %70 = tpu.matmul %37, %69, %cst_34 {dimension_numbers = #tpu.dot_dimension_numbers<[1], [0], [0], [1], [0, 0, 1, 1], [], []>} : vector<32x128xf32>, vector<128x128xf32>, vector<32x128xf32> -> vector<32x128xf32>
    %c2_35 = arith.constant 2 : index
    %c0_36 = arith.constant 0 : index
    %c0_37 = arith.constant 0 : index
    %71 = vector.load %arg7[%c2_35, %c0_36, %c0_37] : memref<3x128x128xf32, #tpu.memory_space<vmem>>, vector<1x128x128xf32>
    %72 = vector.shape_cast %71 : vector<1x128x128xf32> to vector<128x128xf32>
    %cst_38 = arith.constant dense<0.000000e+00> : vector<32x128xf32>
    %73 = tpu.matmul %37, %72, %cst_38 {dimension_numbers = #tpu.dot_dimension_numbers<[1], [0], [0], [1], [0, 0, 1, 1], [], []>} : vector<32x128xf32>, vector<128x128xf32>, vector<32x128xf32> -> vector<32x128xf32>
    %74 = vector.extract_strided_slice %67 {offsets = [16, 0], sizes = [16, 128], strides = [1, 1]} : vector<32x128xf32> to vector<16x128xf32>
    %cst_39 = arith.constant 0.000000e+00 : f32
    %75 = vector.broadcast %cst_39 : f32 to vector<1x128xf32>
    %76 = vector.extract_strided_slice %74 {offsets = [0, 0], sizes = [15, 128], strides = [1, 1]} : vector<16x128xf32> to vector<15x128xf32>
    %77 = tpu.concatenate %75, %76 in 0 : vector<1x128xf32>, vector<15x128xf32> -> vector<16x128xf32>
    %cst_40 = arith.constant 0.000000e+00 : f32
    %78 = vector.shape_cast %18 : vector<16x1xi1> to vector<16x1xi1>
    %79 = vector.broadcast %78 : vector<16x1xi1> to vector<16x128xi1>
    %80 = vector.broadcast %cst_40 : f32 to vector<16x128xf32>
    %81 = arith.select %79, %80, %77 : vector<16x128xi1>, vector<16x128xf32>
    %82 = vector.extract_strided_slice %70 {offsets = [0, 0], sizes = [16, 128], strides = [1, 1]} : vector<32x128xf32> to vector<16x128xf32>
    %83 = arith.addf %81, %82 : vector<16x128xf32>
    %84 = vector.extract_strided_slice %73 {offsets = [16, 0], sizes = [16, 128], strides = [1, 1]} : vector<32x128xf32> to vector<16x128xf32>
    %85 = arith.addf %83, %84 : vector<16x128xf32>
    %c0_41 = arith.constant 0 : index
    %c0_42 = arith.constant 0 : index
    %86 = vector.load %arg8[%c0_41, %c0_42] : memref<2x128xf32, #tpu.memory_space<vmem>>, vector<2x128xf32>
    %87 = vector.extract_strided_slice %86 {offsets = [0, 0], sizes = [1, 128], strides = [1, 1]} : vector<2x128xf32> to vector<1x128xf32>
    %88 = vector.broadcast %87 : vector<1x128xf32> to vector<16x128xf32>
    %89 = arith.mulf %85, %88 : vector<16x128xf32>
    %90 = vector.extract_strided_slice %86 {offsets = [1, 0], sizes = [1, 128], strides = [1, 1]} : vector<2x128xf32> to vector<1x128xf32>
    %91 = vector.broadcast %90 : vector<1x128xf32> to vector<16x128xf32>
    %92 = arith.addf %89, %91 : vector<16x128xf32>
    %cst_43 = arith.constant 0.000000e+00 : f32
    %93 = vector.broadcast %cst_43 : f32 to vector<16x128xf32>
    %94 = arith.maximumf %92, %93 : vector<16x128xf32>
    %95 = vector.extract_strided_slice %67 {offsets = [0, 0], sizes = [16, 128], strides = [1, 1]} : vector<32x128xf32> to vector<16x128xf32>
    %96 = vector.extract_strided_slice %70 {offsets = [16, 0], sizes = [16, 128], strides = [1, 1]} : vector<32x128xf32> to vector<16x128xf32>
    %97 = arith.addf %95, %96 : vector<16x128xf32>
    %98 = vector.extract_strided_slice %73 {offsets = [0, 0], sizes = [16, 128], strides = [1, 1]} : vector<32x128xf32> to vector<16x128xf32>
    %cst_44 = arith.constant 0.000000e+00 : f32
    %99 = vector.broadcast %cst_44 : f32 to vector<1x128xf32>
    %100 = vector.extract_strided_slice %98 {offsets = [1, 0], sizes = [15, 128], strides = [1, 1]} : vector<16x128xf32> to vector<15x128xf32>
    %101 = tpu.concatenate %100, %99 in 0 : vector<15x128xf32>, vector<1x128xf32> -> vector<16x128xf32>
    %cst_45 = arith.constant 0.000000e+00 : f32
    %102 = vector.shape_cast %20 : vector<16x1xi1> to vector<16x1xi1>
    %103 = vector.broadcast %102 : vector<16x1xi1> to vector<16x128xi1>
    %104 = vector.broadcast %cst_45 : f32 to vector<16x128xf32>
    %105 = arith.select %103, %104, %101 : vector<16x128xi1>, vector<16x128xf32>
    %106 = arith.addf %97, %105 : vector<16x128xf32>
    %c0_46 = arith.constant 0 : index
    %c0_47 = arith.constant 0 : index
    %107 = vector.load %arg8[%c0_46, %c0_47] : memref<2x128xf32, #tpu.memory_space<vmem>>, vector<2x128xf32>
    %108 = vector.extract_strided_slice %107 {offsets = [0, 0], sizes = [1, 128], strides = [1, 1]} : vector<2x128xf32> to vector<1x128xf32>
    %109 = vector.broadcast %108 : vector<1x128xf32> to vector<16x128xf32>
    %110 = arith.mulf %106, %109 : vector<16x128xf32>
    %111 = vector.extract_strided_slice %107 {offsets = [1, 0], sizes = [1, 128], strides = [1, 1]} : vector<2x128xf32> to vector<1x128xf32>
    %112 = vector.broadcast %111 : vector<1x128xf32> to vector<16x128xf32>
    %113 = arith.addf %110, %112 : vector<16x128xf32>
    %cst_48 = arith.constant 0.000000e+00 : f32
    %114 = vector.broadcast %cst_48 : f32 to vector<16x128xf32>
    %115 = arith.maximumf %113, %114 : vector<16x128xf32>
    %c1_49 = arith.constant 1 : index
    %c0_50 = arith.constant 0 : index
    %c0_51 = arith.constant 0 : index
    %116 = vector.load %arg9[%c1_49, %c0_50, %c0_51] : memref<3x128x64xf32, #tpu.memory_space<vmem>>, vector<1x128x64xf32>
    %117 = vector.shape_cast %116 : vector<1x128x64xf32> to vector<128x64xf32>
    %cst_52 = arith.constant dense<0.000000e+00> : vector<16x64xf32>
    %118 = tpu.matmul %94, %117, %cst_52 {dimension_numbers = #tpu.dot_dimension_numbers<[1], [0], [0], [1], [0, 0, 1, 1], [], []>} : vector<16x128xf32>, vector<128x64xf32>, vector<16x64xf32> -> vector<16x64xf32>
    %c2_53 = arith.constant 2 : index
    %c0_54 = arith.constant 0 : index
    %c0_55 = arith.constant 0 : index
    %119 = vector.load %arg9[%c2_53, %c0_54, %c0_55] : memref<3x128x64xf32, #tpu.memory_space<vmem>>, vector<1x128x64xf32>
    %120 = vector.shape_cast %119 : vector<1x128x64xf32> to vector<128x64xf32>
    %cst_56 = arith.constant dense<0.000000e+00> : vector<16x64xf32>
    %121 = tpu.matmul %115, %120, %cst_56 {dimension_numbers = #tpu.dot_dimension_numbers<[1], [0], [0], [1], [0, 0, 1, 1], [], []>} : vector<16x128xf32>, vector<128x64xf32>, vector<16x64xf32> -> vector<16x64xf32>
    %122 = arith.addf %118, %121 : vector<16x64xf32>
    %c0_57 = arith.constant 0 : index
    %c0_58 = arith.constant 0 : index
    %c0_59 = arith.constant 0 : index
    %123 = vector.load %arg9[%c0_57, %c0_58, %c0_59] : memref<3x128x64xf32, #tpu.memory_space<vmem>>, vector<1x128x64xf32>
    %124 = vector.shape_cast %123 : vector<1x128x64xf32> to vector<128x64xf32>
    %cst_60 = arith.constant dense<0.000000e+00> : vector<16x64xf32>
    %125 = tpu.matmul %115, %124, %cst_60 {dimension_numbers = #tpu.dot_dimension_numbers<[1], [0], [0], [1], [0, 0, 1, 1], [], []>} : vector<16x128xf32>, vector<128x64xf32>, vector<16x64xf32> -> vector<16x64xf32>
    %cst_61 = arith.constant 0.000000e+00 : f32
    %126 = vector.broadcast %cst_61 : f32 to vector<1x64xf32>
    %127 = vector.extract_strided_slice %125 {offsets = [0, 0], sizes = [15, 64], strides = [1, 1]} : vector<16x64xf32> to vector<15x64xf32>
    %128 = tpu.concatenate %126, %127 in 0 : vector<1x64xf32>, vector<15x64xf32> -> vector<16x64xf32>
    %cst_62 = arith.constant 0.000000e+00 : f32
    %129 = vector.shape_cast %18 : vector<16x1xi1> to vector<16x1xi1>
    %130 = vector.broadcast %129 : vector<16x1xi1> to vector<16x64xi1>
    %131 = vector.broadcast %cst_62 : f32 to vector<16x64xf32>
    %132 = arith.select %130, %131, %128 : vector<16x64xi1>, vector<16x64xf32>
    %133 = arith.addf %122, %132 : vector<16x64xf32>
    %c0_63 = arith.constant 0 : index
    %c0_64 = arith.constant 0 : index
    %134 = vector.load %arg10[%c0_63, %c0_64] : memref<2x64xf32, #tpu.memory_space<vmem>>, vector<2x64xf32>
    %135 = vector.extract_strided_slice %134 {offsets = [0, 0], sizes = [1, 64], strides = [1, 1]} : vector<2x64xf32> to vector<1x64xf32>
    %136 = vector.broadcast %135 : vector<1x64xf32> to vector<16x64xf32>
    %137 = arith.mulf %133, %136 : vector<16x64xf32>
    %138 = vector.extract_strided_slice %134 {offsets = [1, 0], sizes = [1, 64], strides = [1, 1]} : vector<2x64xf32> to vector<1x64xf32>
    %139 = vector.broadcast %138 : vector<1x64xf32> to vector<16x64xf32>
    %140 = arith.addf %137, %139 : vector<16x64xf32>
    %cst_65 = arith.constant 0.000000e+00 : f32
    %141 = vector.broadcast %cst_65 : f32 to vector<16x64xf32>
    %142 = arith.maximumf %140, %141 : vector<16x64xf32>
    %143 = tpu.iota {dimensions = array<i32: 1>} : vector<32x64xi32>
    %c4_i32 = arith.constant 4 : i32
    %144 = vector.broadcast %c4_i32 : i32 to vector<32x64xi32>
    %145 = arith.cmpi slt, %143, %144 : vector<32x64xi32>
    %c4_i32_66 = arith.constant 4 : i32
    %146 = tpu.dynamic_rotate %23 by %c4_i32_66 dim 1 : vector<32x64xf32>, i32 -> vector<32x64xf32>
    %cst_67 = arith.constant 0xFF800000 : f32
    %147 = vector.broadcast %cst_67 : f32 to vector<32x64xf32>
    %148 = arith.select %145, %147, %146 : vector<32x64xi1>, vector<32x64xf32>
    %c60_i32 = arith.constant 60 : i32
    %149 = tpu.dynamic_rotate %23 by %c60_i32 dim 1 : vector<32x64xf32>, i32 -> vector<32x64xf32>
    %150 = arith.maximumf %148, %23 : vector<32x64xf32>
    %151 = arith.maximumf %150, %149 : vector<32x64xf32>
    %152 = vector.extract_strided_slice %151 {offsets = [0, 0], sizes = [16, 64], strides = [1, 1]} : vector<32x64xf32> to vector<16x64xf32>
    %153 = vector.extract_strided_slice %151 {offsets = [16, 0], sizes = [16, 64], strides = [1, 1]} : vector<32x64xf32> to vector<16x64xf32>
    %154 = arith.maximumf %152, %153 : vector<16x64xf32>
    %cst_68 = arith.constant 0xFF800000 : f32
    %155 = vector.broadcast %cst_68 : f32 to vector<1x64xf32>
    %156 = vector.extract_strided_slice %153 {offsets = [0, 0], sizes = [15, 64], strides = [1, 1]} : vector<16x64xf32> to vector<15x64xf32>
    %157 = tpu.concatenate %155, %156 in 0 : vector<1x64xf32>, vector<15x64xf32> -> vector<16x64xf32>
    %cst_69 = arith.constant 0xFF800000 : f32
    %158 = vector.shape_cast %18 : vector<16x1xi1> to vector<16x1xi1>
    %159 = vector.broadcast %158 : vector<16x1xi1> to vector<16x64xi1>
    %160 = vector.broadcast %cst_69 : f32 to vector<16x64xf32>
    %161 = arith.select %159, %160, %157 : vector<16x64xi1>, vector<16x64xf32>
    %162 = arith.maximumf %154, %161 : vector<16x64xf32>
    %cst_70 = arith.constant 0.000000e+00 : f32
    %163 = vector.broadcast %cst_70 : f32 to vector<16x64xf32>
    %164 = tpu.concatenate %64, %142, %162, %163 in 1 : vector<16x64xf32>, vector<16x64xf32>, vector<16x64xf32>, vector<16x64xf32> -> vector<16x256xf32>
    %c0_71 = arith.constant 0 : index
    %c0_72 = arith.constant 0 : index
    %165 = vector.load %arg11[%c0_71, %c0_72] : memref<16x256xf32, #tpu.memory_space<vmem>>, vector<16x256xf32>
    tpu.vector_store %arg11[%c0_71, %c0_72], %164 {strides = array<i32>} : memref<16x256xf32, #tpu.memory_space<vmem>>, vector<16x256xf32>,
    return
  }
  func.func @transform_0(%arg0: i32) -> (i32, i32) {
    %c0_i32 = arith.constant 0 : i32
    %c0_i32_0 = arith.constant 0 : i32
    return %arg0, %c0_i32 : i32, i32
  }
  func.func @transform_1(%arg0: i32) -> (i32, i32) {
    %c0_i32 = arith.constant 0 : i32
    %c0_i32_0 = arith.constant 0 : i32
    return %arg0, %c0_i32 : i32, i32
  }
  func.func @transform_2(%arg0: i32) -> (i32, i32) {
    %c0_i32 = arith.constant 0 : i32
    %c0_i32_0 = arith.constant 0 : i32
    %c0_i32_1 = arith.constant 0 : i32
    return %c0_i32, %c0_i32_0 : i32, i32
  }
  func.func @transform_3(%arg0: i32) -> (i32, i32) {
    %c0_i32 = arith.constant 0 : i32
    %c0_i32_0 = arith.constant 0 : i32
    %c0_i32_1 = arith.constant 0 : i32
    return %c0_i32, %c0_i32_0 : i32, i32
  }
  func.func @transform_4(%arg0: i32) -> (i32, i32, i32) {
    %c0_i32 = arith.constant 0 : i32
    %c0_i32_0 = arith.constant 0 : i32
    %c0_i32_1 = arith.constant 0 : i32
    %c0_i32_2 = arith.constant 0 : i32
    return %c0_i32, %c0_i32_0, %c0_i32_1 : i32, i32, i32
  }
  func.func @transform_5(%arg0: i32) -> (i32, i32) {
    %c0_i32 = arith.constant 0 : i32
    %c0_i32_0 = arith.constant 0 : i32
    %c0_i32_1 = arith.constant 0 : i32
    return %c0_i32, %c0_i32_0 : i32, i32
  }
  func.func @transform_6(%arg0: i32) -> (i32, i32, i32) {
    %c0_i32 = arith.constant 0 : i32
    %c0_i32_0 = arith.constant 0 : i32
    %c0_i32_1 = arith.constant 0 : i32
    %c0_i32_2 = arith.constant 0 : i32
    return %c0_i32, %c0_i32_0, %c0_i32_1 : i32, i32, i32
  }
  func.func @transform_7(%arg0: i32) -> (i32, i32) {
    %c0_i32 = arith.constant 0 : i32
    %c0_i32_0 = arith.constant 0 : i32
    %c0_i32_1 = arith.constant 0 : i32
    return %c0_i32, %c0_i32_0 : i32, i32
  }
  func.func @transform_8(%arg0: i32) -> (i32, i32, i32) {
    %c0_i32 = arith.constant 0 : i32
    %c0_i32_0 = arith.constant 0 : i32
    %c0_i32_1 = arith.constant 0 : i32
    %c0_i32_2 = arith.constant 0 : i32
    return %c0_i32, %c0_i32_0, %c0_i32_1 : i32, i32, i32
  }
  func.func @transform_9(%arg0: i32) -> (i32, i32) {
    %c0_i32 = arith.constant 0 : i32
    %c0_i32_0 = arith.constant 0 : i32
    %c0_i32_1 = arith.constant 0 : i32
    return %c0_i32, %c0_i32_0 : i32, i32
  }
  func.func @transform_10(%arg0: i32) -> (i32, i32) {
    %c0_i32 = arith.constant 0 : i32
    %c0_i32_0 = arith.constant 0 : i32
    return %arg0, %c0_i32 : i32, i32
  }
}

</mosaic_0001>

<bundles_post_ra>
// kernel: tpu_custom_call.1
= control target key start
LH: loop header
LB: loop body
LE: loop exit
PB: predicated region body
PF: predicated region fallthrough
CT: control target
= control target key end

     0   :  { %v2272_v7 = vmov 0.0   ;;  %s3066_s0 = inlined_call_operand.vmem [shape: f32[16,64], index: 0, kind: input, shape index: {}]   ;;  %s3067_s1 = inlined_call_operand.vmem [shape: f32[16,64], index: 1, kind: input, shape index: {}]   ;;  %s3068_s2 = inlined_call_operand.vmem [shape: f32[64,256], index: 2, kind: input, shape index: {}]   ;;  %s3069_s3 = inlined_call_operand.vmem [shape: f32[2,256], index: 3, kind: input, shape index: {}]   ;;  %s3070_s4 = inlined_call_operand.vmem [shape: f32[3,128,64], index: 4, kind: input, shape index: {}]   ;;  %s3071_s5 = inlined_call_operand.vmem [shape: f32[2,64], index: 5, kind: input, shape index: {}]   ;;  %s3072_s6 = inlined_call_operand.vmem [shape: f32[3,128,128], index: 6, kind: input, shape index: {}]   ;;  %s3073_s7 = inlined_call_operand.vmem [shape: f32[2,128], index: 7, kind: input, shape index: {}]   ;;  %s3074_s8 = inlined_call_operand.vmem [shape: f32[3,128,64], index: 8, kind: input, shape index: {}]   ;;  %s3075_s9 = inlined_call_operand.vmem [shape: f32[2,64], index: 9, kind: input, shape index: {}]   ;;  %s3076_s10 = inlined_call_operand.hbm [shape: f32[16,256], index: 10, kind: output, shape index: {}]  }
   0x1   :  { %v72_v0 = vld [vmem:[%s3068_s2 + $0x8] sm:$0xff]  ;;  %v74_v1 = vld [vmem:[%s3068_s2 + $0x18] sm:$0xff]  ;;  %v71_v2 = vld [vmem:[%s3068_s2] sm:$0xff]  ;;  %164 = vmatprep.mubr.f32.mxu0 %v2272_v7 }
   0x2   :  { %v1925_v3 = vpack.c.bf16 %v74_v1, %v72_v0  ;;  %v73_v4 = vld [vmem:[%s3068_s2 + $0x10] sm:$0xff]  ;;  %v76_v5 = vld [vmem:[%s3068_s2 + $0x28] sm:$0xff]  ;;  %v78_v6 = vld [vmem:[%s3068_s2 + $0x38] sm:$0xff] }
   0x3   :  { %v1927_v8 = vpack.c.bf16 %v73_v4, %v71_v2  ;;  %v1929_v9 = vpack.c.bf16 %v78_v6, %v76_v5  ;;  %v75_v10 = vld [vmem:[%s3068_s2 + $0x20] sm:$0xff]  ;;  %v77_v11 = vld [vmem:[%s3068_s2 + $0x30] sm:$0xff]  ;;  %v80_v12 = vld [vmem:[%s3068_s2 + $0x48] sm:$0xff] }
   0x4   :  { %1926 = vmatprep.subr.bf16.mxu0 %v1925_v3  ;;  %v82_v13 = vld [vmem:[%s3068_s2 + $0x58] sm:$0xff]  ;;  %v1931_v14 = vpack.c.bf16 %v77_v11, %v75_v10  ;;  %v79_v16 = vld [vmem:[%s3068_s2 + $0x40] sm:$0xff]  ;;  %v81_v17 = vld [vmem:[%s3068_s2 + $0x50] sm:$0xff] }
   0x5   :  { %1928 = vmatpush1.bf16.msra.mxu0 %v1927_v8  ;;  %v1933_v15 = vpack.c.bf16 %v82_v13, %v80_v12  ;;  %v84_v18 = vld [vmem:[%s3068_s2 + $0x68] sm:$0xff]  ;;  %v86_v19 = vld [vmem:[%s3068_s2 + $0x78] sm:$0xff]  ;;  %v1353_v20 = vld [vmem:[%s3070_s4 + $0x100] sm:$0xff]  ;;  %v1935_v22 = vpack.c.bf16 %v81_v17, %v79_v16 }
   0x6   :  { %1930 = vmatprep.subr.bf16.mxu0 %v1929_v9  ;;  %v1354_v21 = vld [vmem:[%s3070_s4 + $0x108] sm:$0xff]  ;;  %v83_v23 = vld [vmem:[%s3068_s2 + $0x60] sm:$0xff]  ;;  %v1355_v25 = vld [vmem:[%s3070_s4 + $0x110] sm:$0xff]  ;;  %v1937_v27 = vpack.c.bf16 %v86_v19, %v84_v18 }
   0x7   :  { %v1941_v24 = vpack.c.bf16 %v1354_v21, %v1353_v20  ;;  %v1356_v26 = vld [vmem:[%s3070_s4 + $0x118] sm:$0xff]  ;;  %v85_v28 = vld [vmem:[%s3068_s2 + $0x70] sm:$0xff]  ;;  %v1357_v30 = vld [vmem:[%s3070_s4 + $0x120] sm:$0xff] }
   0x8   :  { %v1945_v29 = vpack.c.bf16 %v1356_v26, %v1355_v25  ;;  %v1358_v31 = vld [vmem:[%s3070_s4 + $0x128] sm:$0xff]  ;;  %v435_v32 = vld [vmem:[%s3070_s4] sm:$0xff]  ;;  %v1939_v34 = vpack.c.bf16 %v85_v28, %v83_v23 }
   0x9   :  { %1932 = vmatpush1.bf16.msra.mxu0 %v1931_v14  ;;  %1942 = vmatprep.subr.bf16.mxu1 %v1941_v24  ;;  %v436_v33 = vld [vmem:[%s3070_s4 + $0x8] sm:$0xff]  ;;  %v1949_v35 = vpack.c.bf16 %v1358_v31, %v1357_v30 }
   0xa   :  { %1934 = vmatprep.subr.bf16.mxu0 %v1933_v15  ;;  %1944 = vmatpush3.bf16.msra.mxu1 %v1941_v24 }
   0xb   :  { %1946 = vmatprep.subr.bf16.mxu1 %v1945_v29 }
   0xd   :  { %1936 = vmatpush1.bf16.msra.mxu0 %v1935_v22 }
   0xe   :  { %15 = vsyncpa [#allocation3], 0  ;;  %1938 = vmatprep.subr.bf16.mxu0 %v1937_v27  ;;  %v2005_v36 = vpack.c.bf16 %v436_v33, %v435_v32  ;;  %v437_v37 = vld [vmem:[%s3070_s4 + $0x10] sm:$0xff]  ;;  %v438_v38 = vld [vmem:[%s3070_s4 + $0x18] sm:$0xff]  ;;  %1948 = vmatpush3.bf16.msra.mxu1 %v1945_v29  ;;  %vm87_vm0 = vcmask 523264   ;;  %v36_v19 = vlaneseq  ;;  %vm528_vm1 = vcmask 1040384  }
   0xf   :  { %v1359_v39 = vld [vmem:[%s3070_s4 + $0x130] sm:$0xff]  ;;  %v1360_v40 = vld [vmem:[%s3070_s4 + $0x138] sm:$0xff]  ;;  %v2422_v41 = vld [vmem:[%s3066_s0] sm:$0xff]  ;;  %1950 = vmatprep.subr.bf16.mxu1 %v1949_v35  ;;  %v2009_v42 = vpack.c.bf16 %v438_v38, %v437_v37  ;;  %s2273_s30 = smov 64   ;;  %vm896_vm4 = vcmask 1046528   ;;  %vm1222_vm7 = vcmask 1048064  }
  0x10   :  { %v1953_v43 = vpack.c.bf16 %v1360_v40, %v1359_v39  ;;  %v439_v44 = vld [vmem:[%s3070_s4 + $0x20] sm:$0xff]  ;;  %v440_v45 = vld [vmem:[%s3070_s4 + $0x28] sm:$0xff]  ;;  %v441_v48 = vld [vmem:[%s3070_s4 + $0x30] sm:$0xff]  ;;  %v2523_v20 = vshrl.u32 %v36_v19, 7  ;;  %1223 = vrot.lane.b32.xlu1 %v2422_v41, %s2273_s30  ;;  %s2276_s26 = smov [#allocation2]  }
  0x11   :  { %1940 = vmatpush1.bf16.msra.mxu0 %v1939_v34  ;;  %v2436_v46 = vld [vmem:[%s3066_s0 + $0x8] sm:$0xff]  ;;  %v2013_v47 = vpack.c.bf16 %v440_v45, %v439_v44  ;;  %v442_v49 = vld [vmem:[%s3070_s4 + $0x38] sm:$0xff]  ;;  %v2450_v50 = vld [vmem:[%s3067_s1] sm:$0xff]  ;;  %s1322_s27 = sshll.u32 %s2276_s26, 4  ;;  %s1323_s27 = int_to_ptr.vmem [resolvable:$true] %s1322_s27 }
  0x12   :  { %2006 = vmatprep.subr.bf16.mxu0 %v2005_v36  ;;  %1952 = vmatpush3.bf16.msra.mxu1 %v1949_v35  ;;  %v2017_v51 = vpack.c.bf16 %v442_v49, %v441_v48  ;;  %v2458_v52 = vld [vmem:[%s3067_s1 + $0x8] sm:$0xff]  ;;  %v1361_v53 = vld [vmem:[%s3070_s4 + $0x140] sm:$0xff]  ;;  %v1363_v59 = vld [vmem:[%s3070_s4 + $0x150] sm:$0xff]  ;;  %v2526_v21 = vsub.s32 0, %v2523_v20  ;;  %v197_v22 = vsub.s32 2, %v2523_v20  ;;  %v2533_v25 = vsub.s32 1, %v2523_v20  ;;  %p2253_p1 = scmp.lt.s32.totalorder %s1323_s27, %s1323_s27 }
  0x13   :  { %1954 = vmatprep.subr.bf16.mxu1 %v1953_v43  ;;  %v1362_v54 = vld [vmem:[%s3070_s4 + $0x148] sm:$0xff]  ;;  %v443_v55 = vld [vmem:[%s3070_s4 + $0x40] sm:$0xff]  ;;  %v1364_v60 = vld [vmem:[%s3070_s4 + $0x158] sm:$0xff]  ;;  %v223_v29 = vsub.s32 3, %v2523_v20  ;;  %1229 = vrot.lane.b32.xlu0 %v2450_v50, %s2273_s30 }
  0x14   :  { %1333 = vmatmul.mubr.msk.f32.vlgmr.msra.gmra.mrb[0].mxu0 %vm87_vm0, %v2422_v41  ;;  %v1957_v56 = vpack.c.bf16 %v1362_v54, %v1361_v53  ;;  %v444_v57 = vld [vmem:[%s3070_s4 + $0x48] sm:$0xff]  ;;  %v445_v61 = vld [vmem:[%s3070_s4 + $0x50] sm:$0xff]  ;;  %v1961_v62 = vpack.c.bf16 %v1364_v60, %v1363_v59  ;;  %v446_v63 = vld [vmem:[%s3070_s4 + $0x58] sm:$0xff]  ;;  %1226 = vrot.lane.b32.xlu1 %v2436_v46, %s2273_s30 }
  0x15   :  { %170 = vmatprep.mubr.f32.mxu0 %v2272_v7  ;;  %2008 = vmatpush3.bf16.msra.mxu0 %v2005_v36  ;;  %v2021_v58 = vpack.c.bf16 %v444_v57, %v443_v55  ;;  %v2025_v0 = vpack.c.bf16 %v446_v63, %v445_v61  ;;  %v1365_v1 = vld [vmem:[%s3070_s4 + $0x160] sm:$0xff]  ;;  %v1366_v2 = vld [vmem:[%s3070_s4 + $0x168] sm:$0xff]  ;;  %v1368_v8 = vld [vmem:[%s3070_s4 + $0x178] sm:$0xff] }
  0x16   :  { %2010 = vmatprep.subr.bf16.mxu0 %v2009_v42  ;;  %1956 = vmatpush3.bf16.msra.mxu1 %v1953_v43  ;;  %v447_v3 = vld [vmem:[%s3070_s4 + $0x60] sm:$0xff]  ;;  %v1965_v4 = vpack.c.bf16 %v1366_v2, %v1365_v1  ;;  %v448_v5 = vld [vmem:[%s3070_s4 + $0x68] sm:$0xff]  ;;  %v449_v9 = vld [vmem:[%s3070_s4 + $0x70] sm:$0xff] }
  0x17   :  { %1958 = vmatprep.subr.bf16.mxu1 %v1957_v56  ;;  %v2029_v6 = vpack.c.bf16 %v448_v5, %v447_v3  ;;  %v450_v11 = vld [vmem:[%s3070_s4 + $0x78] sm:$0xff]  ;;  %v1337_v13 = vld [vmem:[%s3070_s4 + $0x80] sm:$0xff]  ;;  %v1338_v14 = vld [vmem:[%s3070_s4 + $0x88] sm:$0xff]  ;;  %1232 = vrot.lane.b32.xlu0 %v2458_v52, %s2273_s30 }
  0x18   :  { %1334 = vmatmul.mubr.msk.f32.gmra.mrb[2].mxu0 %vm87_vm0, %v2436_v46  ;;  %v2033_v12 = vpack.c.bf16 %v450_v11, %v449_v9  ;;  %v558_v15 = vld [vmem:[%s3072_s6] sm:$0xff]  ;;  %v1973_v16 = vpack.c.bf16 %v1338_v14, %v1337_v13  ;;  %v559_v17 = vld [vmem:[%s3072_s6 + $0x8] sm:$0xff]  ;;  %v560_v57 = vld [vmem:[%s3072_s6 + $0x10] sm:$0xff] }
  0x19   :  { %176 = vmatprep.mubr.f32.mxu0 %v2272_v7  ;;  %2012 = vmatpush3.bf16.msra.mxu0 %v2009_v42  ;;  %v2037_v18 = vpack.c.bf16 %v559_v17, %v558_v15  ;;  %v189_v24 = vld [vmem:[%s3069_s3] sm:$0xf]  ;;  %v1342_v63 = vld [vmem:[%s3070_s4 + $0xa8] sm:$0xff]  ;;  %v565_v9 = vld [vmem:[%s3072_s6 + $0x38] sm:$0xff]  ;;  %s2274_s3 = smov 68  }
  0x1a   :  { %2014 = vmatprep.subr.bf16.mxu0 %v2013_v47  ;;  %1960 = vmatpush3.bf16.msra.mxu1 %v1957_v56  ;;  %v194_v27 = vrot.slane %v189_v24, %v2526_v21  ;;  %v198_v28 = vrot.slane %v189_v24, %v197_v22  ;;  %v220_v31 = vrot.slane %v189_v24, %v2533_v25  ;;  %v1340_v56 = vld [vmem:[%s3070_s4 + $0x98] sm:$0xff]  ;;  %v1341_v60 = vld [vmem:[%s3070_s4 + $0xa0] sm:$0xff]  ;;  %v563_v1 = vld [vmem:[%s3072_s6 + $0x28] sm:$0xff] }
  0x1b   :  { %1962 = vmatprep.subr.bf16.mxu1 %v1961_v62  ;;  %v224_v35 = vrot.slane %v189_v24, %v223_v29  ;;  %v1346_v13 = vld [vmem:[%s3070_s4 + $0xc8] sm:$0xff]  ;;  %v566_v14 = vld [vmem:[%s3072_s6 + $0x40] sm:$0xff]  ;;  %v1348_v22 = vld [vmem:[%s3070_s4 + $0xd8] sm:$0xff] }
  0x1c   :  { %1335 = vmatmul.mubr.msk.f32.gmra.mrb[4].mxu0 %vm87_vm0, %v2450_v50  ;;  %v2543_v33 = vrot.slane %v194_v27, %v2526_v21  ;;  %v2546_v34 = vrot.slane %v198_v28, %v2526_v21  ;;  %v2549_v37 = vrot.slane %v220_v31, %v2533_v25  ;;  %v567_v15 = vld [vmem:[%s3072_s6 + $0x48] sm:$0xff]  ;;  %v569_v24 = vld [vmem:[%s3072_s6 + $0x58] sm:$0xff]  ;;  %v1349_v28 = vld [vmem:[%s3070_s4 + $0xe0] sm:$0xff] }
  0x1d   :  { %182 = vmatprep.mubr.f32.mxu0 %v2272_v7  ;;  %2016 = vmatpush3.bf16.msra.mxu0 %v2013_v47  ;;  %v1367_v7 = vld [vmem:[%s3070_s4 + $0x170] sm:$0xff]  ;;  %v2557_v43 = vrot.slane %v224_v35, %v2533_v25  ;;  %v2053_v17 = vpack.c.bf16 %v567_v15, %v566_v14  ;;  %v1350_v29 = vld [vmem:[%s3070_s4 + $0xe8] sm:$0xff]  ;;  %v570_v31 = vld [vmem:[%s3072_s6 + $0x60] sm:$0xff] }
  0x1e   :  { %2018 = vmatprep.subr.bf16.mxu0 %v2017_v51  ;;  %1964 = vmatpush3.bf16.msra.mxu1 %v1961_v62  ;;  %v1969_v10 = vpack.c.bf16 %v1368_v8, %v1367_v7  ;;  %v1344_v7 = vld [vmem:[%s3070_s4 + $0xb8] sm:$0xff]  ;;  %v564_v8 = vld [vmem:[%s3072_s6 + $0x30] sm:$0xff]  ;;  %v571_v35 = vld [vmem:[%s3072_s6 + $0x68] sm:$0xff] }
  0x1f   :  { %1966 = vmatprep.subr.bf16.mxu1 %v1965_v4  ;;  %v2049_v11 = vpack.c.bf16 %v565_v9, %v564_v8  ;;  %v1379_v8 = vld [vmem:[%s3072_s6 + $0xd0] sm:$0xff]  ;;  %v1380_v9 = vld [vmem:[%s3072_s6 + $0xd8] sm:$0xff] }
  0x20   :  { %1336 = vmatmul.mubr.msk.f32.gmra.mrb[6].mxu0 %vm87_vm0, %v2458_v52  ;;  %v1383_v14 = vld [vmem:[%s3072_s6 + $0xf0] sm:$0xff]  ;;  %v1384_v15 = vld [vmem:[%s3072_s6 + $0xf8] sm:$0xff] }
  0x21   :  { %2020 = vmatpush3.bf16.msra.mxu0 %v2017_v51  ;;  %v1339_v51 = vld [vmem:[%s3070_s4 + $0x90] sm:$0xff] }
  0x22   :  { %2022 = vmatprep.subr.bf16.mxu0 %v2021_v58  ;;  %1968 = vmatpush3.bf16.msra.mxu1 %v1965_v4  ;;  %v1977_v61 = vpack.c.bf16 %v1340_v56, %v1339_v51  ;;  %v1981_v4 = vpack.c.bf16 %v1342_v63, %v1341_v60  ;;  %v1374_v63 = vld [vmem:[%s3072_s6 + $0xa8] sm:$0xff] }
  0x23   :  { %1970 = vmatprep.subr.bf16.mxu1 %v1969_v10 }
  0x25   :  { %2024 = vmatpush3.bf16.msra.mxu0 %v2021_v58  ;;  %v561_v58 = vld [vmem:[%s3072_s6 + $0x18] sm:$0xff] }
  0x26   :  { %2026 = vmatprep.subr.bf16.mxu0 %v2025_v0  ;;  %1972 = vmatpush3.bf16.msra.mxu1 %v1969_v10  ;;  %v2041_v62 = vpack.c.bf16 %v561_v58, %v560_v57 }
  0x27   :  { %1974 = vmatprep.subr.bf16.mxu1 %v1973_v16 }
  0x29   :  { %2028 = vmatpush3.bf16.msra.mxu0 %v2025_v0  ;;  %v562_v0 = vld [vmem:[%s3072_s6 + $0x20] sm:$0xff] }
  0x2a   :  { %2030 = vmatprep.subr.bf16.mxu0 %v2029_v6  ;;  %v2045_v5 = vpack.c.bf16 %v563_v1, %v562_v0  ;;  %v1375_v1 = vld [vmem:[%s3072_s6 + $0xb0] sm:$0xff] }
  0x2d   :  { %2032 = vmatpush3.bf16.msra.mxu0 %v2029_v6  ;;  %v1343_v6 = vld [vmem:[%s3070_s4 + $0xb0] sm:$0xff] }
  0x2e   :  { %2034 = vmatprep.subr.bf16.mxu0 %v2033_v12  ;;  %v1985_v10 = vpack.c.bf16 %v1344_v7, %v1343_v6  ;;  %v1378_v6 = vld [vmem:[%s3072_s6 + $0xc8] sm:$0xff] }
  0x31   :  { %2036 = vmatpush3.bf16.msra.mxu0 %v2033_v12  ;;  %v1345_v12 = vld [vmem:[%s3070_s4 + $0xc0] sm:$0xff] }
  0x32   :  { %2038 = vmatprep.subr.bf16.mxu0 %v2037_v18 }
  0xe7   :  { %v166_v23 = vpop.f32.mrb[0].mxu0 }
  0xe8   :  { %v168_v26 = vpop.f32.mrb[1].mxu0  ;;  %v209_v40 = vmul.f32 %v2543_v33, %v166_v23  ;;  %v568_v23 = vld [vmem:[%s3072_s6 + $0x50] sm:$0xff] }
  0xe9   :  { %v210_v42 = vmul.f32 %v2546_v34, %v168_v26  ;;  %v2057_v27 = vpack.c.bf16 %v569_v24, %v568_v23  ;;  %v1387_v23 = vld [vmem:[%s3072_s6 + $0x110] sm:$0xff]  ;;  %v1388_v24 = vld [vmem:[%s3072_s6 + $0x118] sm:$0xff] }
  0xea   :  { %v235_v53 = vadd.f32 %v2549_v37, %v209_v40  ;;  %v1351_v40 = vld [vmem:[%s3070_s4 + $0xf0] sm:$0xff] }
  0xeb   :  { %v2537_v30 = vpop.f32.mrb[2].mxu0  ;;  %v236_v54 = vadd.f32 %v2557_v43, %v210_v42  ;;  %v1352_v42 = vld [vmem:[%s3070_s4 + $0xf8] sm:$0xff] }
  0xec   :  { %v2540_v32 = vpop.f32.mrb[3].mxu0  ;;  %v243_v2 = vmax.f32 %v235_v53, 0.0 }
  0xed   :  { %v2590_v3 = vmax.f32 %v236_v54, 0.0  ;;  %v212_v51 = vmul.f32 %v2546_v34, %v2540_v32  ;;  %v1369_v54 = vld [vmem:[%s3072_s6 + $0x80] sm:$0xff] }
  0xef   :  { %v178_v36 = vpop.f32.mrb[4].mxu0  ;;  %v238_v32 = vadd.f32 %v2557_v43, %v212_v51 }
  0xf0   :  { %v213_v38 = vmul.f32 %v2543_v33, %v178_v36  ;;  %v2552_v39 = vpop.f32.mrb[5].mxu0  ;;  %v1997_v36 = vpack.c.bf16 %v1350_v29, %v1349_v28  ;;  %v1390_v28 = vld [vmem:[%s3072_s6 + $0x128] sm:$0xff] }
  0xf1   :  { %v214_v56 = vmul.f32 %v2546_v34, %v2552_v39  ;;  %v1372_v39 = vld [vmem:[%s3072_s6 + $0x98] sm:$0xff]  ;;  %v2676_v60 = vmax.f32 %v238_v32, 0.0 }
  0xf2   :  { %v239_v44 = vadd.f32 %v2549_v37, %v213_v38  ;;  %v2061_v38 = vpack.c.bf16 %v571_v35, %v570_v31  ;;  %v1391_v31 = vld [vmem:[%s3072_s6 + $0x130] sm:$0xff]  ;;  %v1392_v35 = vld [vmem:[%s3072_s6 + $0x138] sm:$0xff] }
  0xf3   :  { %v184_v45 = vpop.f32.mrb[6].mxu0  ;;  %v240_v58 = vadd.f32 %v2557_v43, %v214_v56  ;;  %v1417_v56 = vld [vmem:[%s3074_s8 + $0x100] sm:$0xff] }
  0xf4   :  { %v215_v47 = vmul.f32 %v2543_v33, %v184_v45  ;;  %v2561_v48 = vpop.f32.mrb[7].mxu0  ;;  %v247_v49 = vmax.f32 %v239_v44, 0.0  ;;  %v572_v44 = vld [vmem:[%s3072_s6 + $0x70] sm:$0xff]  ;;  %v573_v45 = vld [vmem:[%s3072_s6 + $0x78] sm:$0xff] }
  0xf5   :  { %v2065_v53 = vpack.c.bf16 %v573_v45, %v572_v44  ;;  %v216_v57 = vmul.f32 %v2546_v34, %v2561_v48  ;;  %v2679_v48 = vmax.f32 %v240_v58, 0.0  ;;  %v1395_v44 = vld [vmem:[%s3072_s6 + $0x150] sm:$0xff] }
  0xf6   :  { %v241_v55 = vadd.f32 %v2549_v37, %v215_v47  ;;  %1633 = vmatprep.mubr.f32.mxu1 %v247_v49  ;;  %1703 = vmatprep.mubr.f32.mxu0 %v247_v49  ;;  %v2001_v47 = vpack.c.bf16 %v1352_v42, %v1351_v40  ;;  %v211_v49 = vmul.f32 %v2543_v33, %v2537_v30  ;;  %v1394_v40 = vld [vmem:[%s3072_s6 + $0x148] sm:$0xff] }
  0xf8   :  { %v249_v59 = vmax.f32 %v241_v55, 0.0  ;;  %v1370_v55 = vld [vmem:[%s3072_s6 + $0x88] sm:$0xff]  ;;  %v237_v33 = vadd.f32 %v2549_v37, %v211_v49 }
  0xf9   :  { %v2069_v30 = vpack.c.bf16 %v1370_v55, %v1369_v54  ;;  %v1398_v49 = vld [vmem:[%s3072_s6 + $0x168] sm:$0xff]  ;;  %v1400_v54 = vld [vmem:[%s3072_s6 + $0x178] sm:$0xff] }
  0xfa   :  { %1634 = vmatmul.mubr.f32.vlgmr.msra.gmra.mrb[0].mxu1 %v249_v59  ;;  %1704 = vmatmul.mubr.f32.vlgmr.msra.gmra.mrb[8].mxu0 %v249_v59  ;;  %v1371_v59 = vld [vmem:[%s3072_s6 + $0x90] sm:$0xff]  ;;  %v245_v37 = vmax.f32 %v237_v33, 0.0 }
  0xfb   :  { %1976 = vmatpush3.bf16.msra.mxu1 %v1973_v16  ;;  %2040 = vmatpush3.bf16.msra.mxu0 %v2037_v18  ;;  %v1989_v16 = vpack.c.bf16 %v1346_v13, %v1345_v12  ;;  %v1347_v18 = vld [vmem:[%s3070_s4 + $0xd0] sm:$0xff]  ;;  %v2073_v34 = vpack.c.bf16 %v1372_v39, %v1371_v59  ;;  %v1382_v12 = vld [vmem:[%s3072_s6 + $0xe8] sm:$0xff]  ;;  %v1421_v59 = vld [vmem:[%s3074_s8 + $0x120] sm:$0xff] }
  0xfc   :  { %1668 = vmatprep.mubr.f32.mxu1 %v243_v2  ;;  %1738 = vmatprep.mubr.f32.mxu0 %v2590_v3  ;;  %v1993_v26 = vpack.c.bf16 %v1348_v22, %v1347_v18  ;;  %v1376_v2 = vld [vmem:[%s3072_s6 + $0xb8] sm:$0xff]  ;;  %v1386_v18 = vld [vmem:[%s3072_s6 + $0x108] sm:$0xff]  ;;  %v1419_v33 = vld [vmem:[%s3074_s8 + $0x110] sm:$0xff] }
  0xfd   :  { %1978 = vmatprep.subr.bf16.mxu1 %v1977_v61  ;;  %2042 = vmatprep.subr.bf16.mxu0 %v2041_v62  ;;  %v1422_v39 = vld [vmem:[%s3074_s8 + $0x128] sm:$0xff] }
  0xff   :  { %1980 = vmatpush3.bf16.msra.mxu1 %v1977_v61  ;;  %2044 = vmatpush3.bf16.msra.mxu0 %v2041_v62  ;;  %v242_v61 = vadd.f32 %v2557_v43, %v216_v57  ;;  %v1373_v62 = vld [vmem:[%s3072_s6 + $0xa0] sm:$0xff]  ;;  %v1420_v57 = vld [vmem:[%s3074_s8 + $0x118] sm:$0xff] }
 0x100   :  { %1982 = vmatprep.subr.bf16.mxu1 %v1981_v4  ;;  %2046 = vmatprep.subr.bf16.mxu0 %v2045_v5  ;;  %v2077_v43 = vpack.c.bf16 %v1374_v63, %v1373_v62  ;;  %v2137_v58 = vpack.c.bf16 %v1420_v57, %v1419_v33  ;;  %v1426_v62 = vld [vmem:[%s3074_s8 + $0x148] sm:$0xff] }
 0x101   :  { %v2689_v0 = vmax.f32 %v242_v61, 0.0  ;;  %v1424_v61 = vld [vmem:[%s3074_s8 + $0x138] sm:$0xff] }
 0x103   :  { %1984 = vmatpush3.bf16.msra.mxu1 %v1981_v4  ;;  %2048 = vmatpush3.bf16.msra.mxu0 %v2045_v5  ;;  %v2081_v4 = vpack.c.bf16 %v1376_v2, %v1375_v1  ;;  %v1377_v5 = vld [vmem:[%s3072_s6 + $0xc0] sm:$0xff] }
 0x104   :  { %1986 = vmatprep.subr.bf16.mxu1 %v1985_v10  ;;  %2050 = vmatprep.subr.bf16.mxu0 %v2049_v11  ;;  %v2085_v7 = vpack.c.bf16 %v1378_v6, %v1377_v5  ;;  %v1429_v2 = vld [vmem:[%s3074_s8 + $0x160] sm:$0xff]  ;;  %v1431_v6 = vld [vmem:[%s3074_s8 + $0x170] sm:$0xff] }
 0x107   :  { %1988 = vmatpush3.bf16.msra.mxu1 %v1985_v10  ;;  %2052 = vmatpush3.bf16.msra.mxu0 %v2049_v11  ;;  %v2089_v10 = vpack.c.bf16 %v1380_v9, %v1379_v8  ;;  %v1381_v11 = vld [vmem:[%s3072_s6 + $0xe0] sm:$0xff] }
 0x108   :  { %1990 = vmatprep.subr.bf16.mxu1 %v1989_v16  ;;  %2054 = vmatprep.subr.bf16.mxu0 %v2053_v17  ;;  %v2093_v13 = vpack.c.bf16 %v1382_v12, %v1381_v11  ;;  %v1401_v9 = vld [vmem:[%s3074_s8 + $0x80] sm:$0xff] }
 0x10b   :  { %1992 = vmatpush3.bf16.msra.mxu1 %v1989_v16  ;;  %2056 = vmatpush3.bf16.msra.mxu0 %v2053_v17  ;;  %v2097_v16 = vpack.c.bf16 %v1384_v15, %v1383_v14  ;;  %v1385_v17 = vld [vmem:[%s3072_s6 + $0x100] sm:$0xff] }
 0x10c   :  { %1994 = vmatprep.subr.bf16.mxu1 %v1993_v26  ;;  %2058 = vmatprep.subr.bf16.mxu0 %v2057_v27  ;;  %v2101_v22 = vpack.c.bf16 %v1386_v18, %v1385_v17  ;;  %v38_v17 = vadd.s32 8, %v2523_v20 }
 0x10e   :  { %v50_v18 = vand.u32 7, %v38_v17  ;;  %v1230_v17 = vpop.permute.xlu0 %1229 }
 0x10f   :  { %1996 = vmatpush3.bf16.msra.mxu1 %v1993_v26  ;;  %2060 = vmatpush3.bf16.msra.mxu0 %v2057_v27  ;;  %v2105_v26 = vpack.c.bf16 %v1388_v24, %v1387_v23  ;;  %v1389_v27 = vld [vmem:[%s3072_s6 + $0x120] sm:$0xff] }
 0x110   :  { %1998 = vmatprep.subr.bf16.mxu1 %v1997_v36  ;;  %2062 = vmatprep.subr.bf16.mxu0 %v2061_v38  ;;  %v2109_v29 = vpack.c.bf16 %v1390_v28, %v1389_v27  ;;  %vm2846_vm2 = vcmp.eq.s32.totalorder %v50_v18, 0  ;;  %vm66_vm5 = vcmp.eq.s32.totalorder %v50_v18, 7  ;;  %v1224_v18 = vpop.permute.xlu1 %1223  ;;  %v543_v24 = vld [vmem:[%s3071_s5] sm:$0x3]  ;;  %s2248_s5 = scalar_lea.vmem %s1323_s27, 512 }
 0x111   :  { %v547_v23 = vrot.slane %v543_v24, %v2526_v21  ;;  %p2249_p0 = scmp.ne.s32.totalorder %s1323_s27, %s2248_s5  ;;  %p2254_p2 = scmp.lt.s32.totalorder %s2248_s5, %s2248_s5 }
 0x113   :  { %2000 = vmatpush3.bf16.msra.mxu1 %v1997_v36  ;;  %2064 = vmatpush3.bf16.msra.mxu0 %v2061_v38  ;;  %v2113_v36 = vpack.c.bf16 %v1392_v35, %v1391_v31  ;;  %v1393_v38 = vld [vmem:[%s3072_s6 + $0x140] sm:$0xff]  ;;  %p2255_p3 = por %p2254_p2, %p2253_p1 }
 0x114   :  { %2002 = vmatprep.subr.bf16.mxu1 %v2001_v47  ;;  %2066 = vmatprep.subr.bf16.mxu0 %v2065_v53  ;;  %v2117_v42 = vpack.c.bf16 %v1394_v40, %v1393_v38 }
 0x115   :  { %p2256_p4 = pnand %p2255_p3, %p2249_p0 }
 0x117   :  { %2004 = vmatpush3.bf16.msra.mxu1 %v2001_v47  ;;  %2068 = vmatpush3.bf16.msra.mxu0 %v2065_v53  ;;  %v1397_v47 = vld [vmem:[%s3072_s6 + $0x160] sm:$0xff]  ;;  %v1399_v53 = vld [vmem:[%s3072_s6 + $0x170] sm:$0xff] }
 0x118   :  { %2070 = vmatprep.subr.bf16.mxu0 %v2069_v30  ;;  %v2125_v51 = vpack.c.bf16 %v1398_v49, %v1397_v47  ;;  %v2129_v55 = vpack.c.bf16 %v1400_v54, %v1399_v53  ;;  %v877_v49 = vld [vmem:[%s3073_s7] sm:$0x3] }
 0x11a   :  { %1669 = vmatmul.mubr.f32.vlgmr.msra.gmra.mrb[0].mxu1 %v245_v37  ;;  %1739 = vmatmul.mubr.f32.vlgmr.msra.gmra.mrb[10].mxu0 %v2676_v60  ;;  %v2141_v37 = vpack.c.bf16 %v1422_v39, %v1421_v59  ;;  %v2874_v59 = vrot.slane %v877_v49, %v2533_v25 }
 0x11b   :  { %1741 = vmatprep.mubr.f32.mxu0 %v2679_v48  ;;  %2072 = vmatpush3.bf16.msra.mxu0 %v2069_v30  ;;  %v1418_v30 = vld [vmem:[%s3074_s8 + $0x108] sm:$0xff] }
 0x11c   :  { %2074 = vmatprep.subr.bf16.mxu0 %v2073_v34  ;;  %v2133_v32 = vpack.c.bf16 %v1418_v30, %v1417_v56  ;;  %v2869_v56 = vrot.slane %v877_v49, %v2526_v21 }
 0x11e   :  { %1742 = vmatmul.mubr.f32.gmra.mrb[12].mxu0 %v2689_v0  ;;  %2134 = vmatprep.subr.bf16.mxu1 %v2133_v32 }
 0x11f   :  { %2076 = vmatpush3.bf16.msra.mxu0 %v2073_v34  ;;  %1776 = vmatprep.mubr.f32.mxu0 %v2590_v3 }
 0x120   :  { %2078 = vmatprep.subr.bf16.mxu0 %v2077_v43  ;;  %2136 = vmatpush3.bf16.msra.mxu1 %v2133_v32 }
 0x121   :  { %2138 = vmatprep.subr.bf16.mxu1 %v2137_v58 }
 0x123   :  { %2080 = vmatpush3.bf16.msra.mxu0 %v2077_v43  ;;  %v1428_v43 = vld [vmem:[%s3074_s8 + $0x158] sm:$0xff] }
 0x124   :  { %2082 = vmatprep.subr.bf16.mxu0 %v2081_v4  ;;  %2140 = vmatpush3.bf16.msra.mxu1 %v2137_v58 }
 0x125   :  { %2142 = vmatprep.subr.bf16.mxu1 %v2141_v37 }
 0x127   :  { %2084 = vmatpush3.bf16.msra.mxu0 %v2081_v4  ;;  %v1430_v4 = vld [vmem:[%s3074_s8 + $0x168] sm:$0xff] }
 0x128   :  { %2086 = vmatprep.subr.bf16.mxu0 %v2085_v7  ;;  %2144 = vmatpush3.bf16.msra.mxu1 %v2141_v37  ;;  %v2157_v5 = vpack.c.bf16 %v1430_v4, %v1429_v2 }
 0x12b   :  { %2088 = vmatpush3.bf16.msra.mxu0 %v2085_v7  ;;  %v1432_v7 = vld [vmem:[%s3074_s8 + $0x178] sm:$0xff] }
 0x12c   :  { %2090 = vmatprep.subr.bf16.mxu0 %v2089_v10  ;;  %v2161_v8 = vpack.c.bf16 %v1432_v7, %v1431_v6  ;;  %v1404_v6 = vld [vmem:[%s3074_s8 + $0x98] sm:$0xff] }
 0x12f   :  { %2092 = vmatpush3.bf16.msra.mxu0 %v2089_v10  ;;  %v1402_v10 = vld [vmem:[%s3074_s8 + $0x88] sm:$0xff] }
 0x130   :  { %2094 = vmatprep.subr.bf16.mxu0 %v2093_v13  ;;  %v2832_v11 = vpack.c.bf16 %v1402_v10, %v1401_v9 }
 0x133   :  { %2096 = vmatpush3.bf16.msra.mxu0 %v2093_v13 }
 0x134   :  { %2098 = vmatprep.subr.bf16.mxu0 %v2097_v16 }
 0x137   :  { %2100 = vmatpush3.bf16.msra.mxu0 %v2097_v16 }
 0x138   :  { %2102 = vmatprep.subr.bf16.mxu0 %v2101_v22 }
 0x13a   :  { %1777 = vmatmul.mubr.f32.vlgmr.msra.gmra.mrb[14].mxu0 %v2676_v60 }
 0x13b   :  { %1779 = vmatprep.mubr.f32.mxu0 %v2679_v48  ;;  %2104 = vmatpush3.bf16.msra.mxu0 %v2101_v22  ;;  %v43_v22 = vand.u32 7, %v2523_v20 }
 0x13c   :  { %2106 = vmatprep.subr.bf16.mxu0 %v2105_v26 }
 0x13d   :  { %vm2850_vm3 = vcmp.eq.s32.totalorder %v43_v22, 0  ;;  %vm65_vm6 = vcmp.eq.s32.totalorder %v43_v22, 7 }
 0x13e   :  { %1780 = vmatmul.mubr.f32.gmra.mrb[10].mxu0 %v2689_v0 }
 0x13f   :  { %2108 = vmatpush3.bf16.msra.mxu0 %v2105_v26  ;;  %1814 = vmatprep.mubr.f32.mxu0 %v2590_v3  ;;  %v1396_v3 = vld [vmem:[%s3072_s6 + $0x158] sm:$0xff] }
 0x140   :  { %2110 = vmatprep.subr.bf16.mxu0 %v2109_v29  ;;  %v2121_v45 = vpack.c.bf16 %v1396_v3, %v1395_v44 }
 0x143   :  { %2112 = vmatpush3.bf16.msra.mxu0 %v2109_v29 }
 0x144   :  { %2114 = vmatprep.subr.bf16.mxu0 %v2113_v36 }
 0x147   :  { %2116 = vmatpush3.bf16.msra.mxu0 %v2113_v36 }
 0x148   :  { %2118 = vmatprep.subr.bf16.mxu0 %v2117_v42 }
 0x14b   :  { %2120 = vmatpush3.bf16.msra.mxu0 %v2117_v42 }
 0x14c   :  { %2122 = vmatprep.subr.bf16.mxu0 %v2121_v45 }
 0x14f   :  { %2124 = vmatpush3.bf16.msra.mxu0 %v2121_v45 }
 0x150   :  { %2126 = vmatprep.subr.bf16.mxu0 %v2125_v51 }
 0x153   :  { %2128 = vmatpush3.bf16.msra.mxu0 %v2125_v51 }
 0x154   :  { %2130 = vmatprep.subr.bf16.mxu0 %v2129_v55 }
 0x157   :  { %2132 = vmatpush3.bf16.msra.mxu0 %v2129_v55 }
 0x15a   :  { %1815 = vmatmul.mubr.f32.vlgmr.msra.gmra.mrb[16].mxu0 %v2676_v60  ;;  %v1423_v60 = vld [vmem:[%s3074_s8 + $0x130] sm:$0xff] }
 0x15b   :  { %1817 = vmatprep.mubr.f32.mxu0 %v2679_v48  ;;  %v2145_v34 = vpack.c.bf16 %v1424_v61, %v1423_v60  ;;  %v1425_v48 = vld [vmem:[%s3074_s8 + $0x140] sm:$0xff] }
 0x15c   :  { %v2149_v63 = vpack.c.bf16 %v1426_v62, %v1425_v48 }
 0x15d   :  { %2146 = vmatprep.subr.bf16.mxu1 %v2145_v34 }
 0x15e   :  { %1818 = vmatmul.mubr.f32.gmra.mrb[14].mxu0 %v2689_v0  ;;  %2148 = vmatpush3.bf16.msra.mxu1 %v2145_v34  ;;  %v1427_v0 = vld [vmem:[%s3074_s8 + $0x150] sm:$0xff] }
 0x15f   :  { %2150 = vmatprep.subr.bf16.mxu1 %v2149_v63  ;;  %v2153_v1 = vpack.c.bf16 %v1428_v43, %v1427_v0 }
 0x162   :  { %2152 = vmatpush3.bf16.msra.mxu1 %v2149_v63 }
 0x163   :  { %2154 = vmatprep.subr.bf16.mxu1 %v2153_v1 }
 0x166   :  { %2156 = vmatpush3.bf16.msra.mxu1 %v2153_v1 }
 0x167   :  { %2158 = vmatprep.subr.bf16.mxu1 %v2157_v5 }
 0x16a   :  { %2160 = vmatpush3.bf16.msra.mxu1 %v2157_v5  ;;  %v1403_v5 = vld [vmem:[%s3074_s8 + $0x90] sm:$0xff] }
 0x16b   :  { %2162 = vmatprep.subr.bf16.mxu1 %v2161_v8  ;;  %v2169_v9 = vpack.c.bf16 %v1404_v6, %v1403_v5  ;;  %v1113_v6 = vld [vmem:[%s3074_s8 + $0x60] sm:$0xff] }
 0x16e   :  { %2164 = vmatpush3.bf16.msra.mxu1 %v2161_v8 }
 0x16f   :  { %2166 = vmatprep.subr.bf16.mxu1 %v2832_v11 }
 0x1cd   :  { %v1705_v12 = vpop.f32.mrb[8].mxu0 }
 0x1ce   :  { %v530_v13 = vrot.slane %v1705_v12, 7  ;;  %v517_v14 = vpop.f32.mrb[9].mxu0  ;;  %v1405_v12 = vld [vmem:[%s3074_s8 + $0xa0] sm:$0xff] }
 0x1cf   :  { %v529_v15 = vrot.slane %v517_v14, 7 }
 0x1d1   :  { %v531_v16 = vsel %vm528_vm1, %v529_v15, %v530_v13  ;;  %v534_v26 = vsel %vm528_vm1, 0.0, %v529_v15  ;;  %v1406_v13 = vld [vmem:[%s3074_s8 + $0xa8] sm:$0xff]  ;;  %v1407_v15 = vld [vmem:[%s3074_s8 + $0xb0] sm:$0xff] }
 0x1d2   :  { %v540_v28 = vsel %vm2846_vm2, 0.0, %v531_v16  ;;  %v539_v20 = vsel %vm2850_vm3, 0.0, %v534_v26  ;;  %v2173_v14 = vpack.c.bf16 %v1406_v13, %v1405_v12  ;;  %v1408_v16 = vld [vmem:[%s3074_s8 + $0xb8] sm:$0xff]  ;;  %v1409_v26 = vld [vmem:[%s3074_s8 + $0xc0] sm:$0xff] }
 0x1d3   :  { %v2177_v22 = vpack.c.bf16 %v1408_v16, %v1407_v15  ;;  %v1116_v12 = vld [vmem:[%s3074_s8 + $0x78] sm:$0xff] }
 0x1ed   :  { %v1670_v27 = vpop.f32.mrb[0].mxu1 }
 0x1ee   :  { %v2857_v29 = vadd.f32 %v1670_v27, %v540_v28  ;;  %v426_v31 = vpop.f32.mrb[1].mxu1  ;;  %v1410_v27 = vld [vmem:[%s3074_s8 + $0xc8] sm:$0xff]  ;;  %v1225_v28 = vsel %vm1222_vm7, %v1224_v18, %v2422_v41 }
 0x1ef   :  { %v2861_v35 = vadd.f32 %v539_v20, %v426_v31  ;;  %v1233_v31 = vpop.permute.xlu0 %1232  ;;  %v1227_v20 = vpop.permute.xlu1 %1226 }
 0x1f1   :  { %v1743_v36 = vpop.f32.mrb[12].mxu0 }
 0x1f2   :  { %v866_v38 = vrot.slane %v1743_v36, 7  ;;  %v650_v40 = vpop.f32.mrb[13].mxu0  ;;  %v2181_v36 = vpack.c.bf16 %v1410_v27, %v1409_v26 }
 0x1f3   :  { %v865_v42 = vrot.slane %v650_v40, 7  ;;  %v1411_v40 = vld [vmem:[%s3074_s8 + $0xd0] sm:$0xff] }
 0x1f5   :  { %v867_v44 = vsel %vm528_vm1, %v865_v42, %v866_v38  ;;  %v870_v55 = vsel %vm528_vm1, 0.0, %v865_v42  ;;  %v1234_v38 = vsel %vm1222_vm7, %v1233_v31, %v2458_v52  ;;  %v1412_v42 = vld [vmem:[%s3074_s8 + $0xd8] sm:$0xff] }
 0x1f6   :  { %v872_v58 = vsel %vm2846_vm2, 0.0, %v867_v44  ;;  %v871_v34 = vsel %vm2850_vm3, 0.0, %v870_v55  ;;  %1241 = vrot.lane.b32.xlu1 %v1234_v38, %s2273_s30  ;;  %v1228_v44 = vsel %vm1222_vm7, %v1227_v20, %v2436_v46 }
 0x1fa   :  { %1237 = vrot.lane.b32.xlu1 %v1228_v44, %s2273_s30 }
 0x211   :  { %v1781_v3 = vpop.f32.mrb[10].mxu0 }
 0x212   :  { %v752_v45 = vpop.f32.mrb[11].mxu0 }
 0x22d   :  { %v1816_v47 = vpop.f32.mrb[16].mxu0 }
 0x22e   :  { %v898_v51 = vrot.slane %v1816_v47, 1  ;;  %v844_v53 = vpop.f32.mrb[17].mxu0  ;;  %v1414_v47 = vld [vmem:[%s3074_s8 + $0xe8] sm:$0xff] }
 0x22f   :  { %v897_v54 = vrot.slane %v844_v53, 1  ;;  %v1416_v53 = vld [vmem:[%s3074_s8 + $0xf8] sm:$0xff] }
 0x230   :  { %v902_v30 = vsel %vm896_vm4, %v898_v51, 0.0 }
 0x231   :  { %v908_v33 = vsel %vm66_vm5, 0.0, %v902_v30  ;;  %v899_v32 = vsel %vm896_vm4, %v897_v54, %v898_v51  ;;  %v1819_v57 = vpop.f32.mrb[14].mxu0  ;;  %v1415_v51 = vld [vmem:[%s3074_s8 + $0xf0] sm:$0xff]  ;;  %v1101_v30 = vld [vmem:[%s3074_s8] sm:$0xff] }
 0x232   :  { %v910_v39 = vadd.f32 %v1781_v3, %v908_v33  ;;  %v907_v37 = vsel %vm65_vm6, 0.0, %v899_v32  ;;  %v2229_v60 = vadd.f32 %v1819_v57, %v872_v58  ;;  %v854_v61 = vpop.f32.mrb[15].mxu0  ;;  %v2185_v3 = vpack.c.bf16 %v1412_v42, %v1411_v40  ;;  %v1102_v33 = vld [vmem:[%s3074_s8 + $0x8] sm:$0xff]  ;;  %v1103_v58 = vld [vmem:[%s3074_s8 + $0x10] sm:$0xff] }
 0x233   :  { %v909_v48 = vadd.f32 %v907_v37, %v752_v45  ;;  %v2230_v62 = vadd.f32 %v871_v34, %v854_v61  ;;  %v1413_v45 = vld [vmem:[%s3074_s8 + $0xe0] sm:$0xff]  ;;  %v2193_v55 = vpack.c.bf16 %v1416_v53, %v1415_v51  ;;  %v2197_v57 = vpack.c.bf16 %v1102_v33, %v1101_v30  ;;  %v1107_v34 = vld [vmem:[%s3074_s8 + $0x30] sm:$0xff]  ;;  %v2247_v53 = vld [vmem:[%s3066_s0 + $0x8] sm:$0xff] }
 0x234   :  { %v912_v63 = vmul.f32 %v910_v39, %v2869_v56  ;;  %v2189_v49 = vpack.c.bf16 %v1414_v47, %v1413_v45  ;;  %v883_v54 = vmul.f32 %v2229_v60, %v2869_v56  ;;  %v1105_v60 = vld [vmem:[%s3074_s8 + $0x20] sm:$0xff] }
 0x235   :  { %v882_v0 = vmul.f32 %v2230_v62, %v2869_v56  ;;  %v911_v43 = vmul.f32 %v909_v48, %v2869_v56  ;;  %v1104_v56 = vld [vmem:[%s3074_s8 + $0x18] sm:$0xff] }
 0x236   :  { %v2882_v1 = vadd.f32 %v912_v63, %v2874_v59  ;;  %v889_v32 = vadd.f32 %v2874_v59, %v883_v54  ;;  %v2201_v37 = vpack.c.bf16 %v1104_v56, %v1103_v58  ;;  %v1108_v48 = vld [vmem:[%s3074_s8 + $0x38] sm:$0xff]  ;;  %v1109_v63 = vld [vmem:[%s3074_s8 + $0x40] sm:$0xff] }
 0x237   :  { %v2885_v2 = vadd.f32 %v911_v43, %v2874_v59  ;;  %v888_v4 = vadd.f32 %v2874_v59, %v882_v0  ;;  %v1106_v59 = vld [vmem:[%s3074_s8 + $0x28] sm:$0xff]  ;;  %v2209_v62 = vpack.c.bf16 %v1108_v48, %v1107_v34 }
 0x238   :  { %v916_v8 = vmax.f32 %v2882_v1, 0.0  ;;  %v891_v39 = vmax.f32 %v889_v32, 0.0  ;;  %v2205_v61 = vpack.c.bf16 %v1106_v59, %v1105_v60  ;;  %v1110_v0 = vld [vmem:[%s3074_s8 + $0x48] sm:$0xff] }
 0x239   :  { %v915_v7 = vmax.f32 %v2885_v2, 0.0  ;;  %v890_v10 = vmax.f32 %v888_v4, 0.0  ;;  %v2213_v43 = vpack.c.bf16 %v1110_v0, %v1109_v63  ;;  %v1111_v2 = vld [vmem:[%s3074_s8 + $0x50] sm:$0xff]  ;;  %v1112_v4 = vld [vmem:[%s3074_s8 + $0x58] sm:$0xff] }
 0x23a   :  { %v2217_v5 = vpack.c.bf16 %v1112_v4, %v1111_v2 }
 0x23b   :  { %1852 = vmatprep.mubr.f32.mxu1 %v915_v7 }
 0x23c   :  { %1853 = vmatmul.mubr.f32.vlgmr.msra.gmra.mrb[2].mxu1 %v916_v8 }
 0x23d   :  { %2168 = vmatpush3.bf16.msra.mxu1 %v2832_v11  ;;  %1887 = vmatprep.mubr.f32.mxu1 %v890_v10  ;;  %v1231_v11 = vsel %vm1222_vm7, %v1230_v17, %v2450_v50  ;;  %v1115_v10 = vld [vmem:[%s3074_s8 + $0x70] sm:$0xff] }
 0x23e   :  { %2170 = vmatprep.subr.bf16.mxu1 %v2169_v9  ;;  %1239 = vrot.lane.b32.xlu0 %v1231_v11, %s2273_s30  ;;  %v2225_v13 = vpack.c.bf16 %v1116_v12, %v1115_v10 }
 0x241   :  { %2172 = vmatpush3.bf16.msra.mxu1 %v2169_v9 }
 0x242   :  { %2174 = vmatprep.subr.bf16.mxu1 %v2173_v14  ;;  %1235 = vrot.lane.b32.xlu0 %v1225_v28, %s2273_s30 }
 0x245   :  { %2176 = vmatpush3.bf16.msra.mxu1 %v2173_v14 }
 0x246   :  { %2178 = vmatprep.subr.bf16.mxu1 %v2177_v22 }
 0x249   :  { %2180 = vmatpush3.bf16.msra.mxu1 %v2177_v22 }
 0x24a   :  { %2182 = vmatprep.subr.bf16.mxu1 %v2181_v36 }
 0x24d   :  { %2184 = vmatpush3.bf16.msra.mxu1 %v2181_v36 }
 0x24e   :  { %2186 = vmatprep.subr.bf16.mxu1 %v2185_v3 }
 0x251   :  { %2188 = vmatpush3.bf16.msra.mxu1 %v2185_v3 }
 0x252   :  { %2190 = vmatprep.subr.bf16.mxu1 %v2189_v49 }
 0x255   :  { %2192 = vmatpush3.bf16.msra.mxu1 %v2189_v49 }
 0x256   :  { %2194 = vmatprep.subr.bf16.mxu1 %v2193_v55 }
 0x259   :  { %2196 = vmatpush3.bf16.msra.mxu1 %v2193_v55 }
 0x25a   :  { %2198 = vmatprep.subr.bf16.mxu1 %v2197_v57 }
 0x25c   :  { %1888 = vmatmul.mubr.f32.vlgmr.msra.gmra.mrb[2].mxu1 %v891_v39 }
 0x25d   :  { %2200 = vmatpush3.bf16.msra.mxu1 %v2197_v57  ;;  %1922 = vmatprep.mubr.f32.mxu1 %v915_v7  ;;  %v1114_v7 = vld [vmem:[%s3074_s8 + $0x68] sm:$0xff]  ;;  %s2275_s8 = smov 124  }
 0x25e   :  { %2202 = vmatprep.subr.bf16.mxu1 %v2201_v37  ;;  %v2221_v9 = vpack.c.bf16 %v1114_v7, %v1113_v6 }
 0x261   :  { %2204 = vmatpush3.bf16.msra.mxu1 %v2201_v37 }
 0x262   :  { %2206 = vmatprep.subr.bf16.mxu1 %v2205_v61 }
 0x265   :  { %2208 = vmatpush3.bf16.msra.mxu1 %v2205_v61 }
 0x266   :  { %2210 = vmatprep.subr.bf16.mxu1 %v2209_v62 }
 0x268   :  { %v1242_v16 = vpop.permute.xlu1 %1241 }
 0x269   :  { %2212 = vmatpush3.bf16.msra.mxu1 %v2209_v62  ;;  %v1246_v18 = vsel %vm1222_vm7, %v1242_v16, %v2458_v52 }
 0x26a   :  { %2214 = vmatprep.subr.bf16.mxu1 %v2213_v43  ;;  %1257 = vrot.lane.b32.xlu1 %v1246_v18, %s2274_s3 }
 0x26c   :  { %v1238_v11 = vpop.permute.xlu1 %1237 }
 0x26d   :  { %2216 = vmatpush3.bf16.msra.mxu1 %v2213_v43  ;;  %v1244_v1 = vsel %vm1222_vm7, %v1238_v11, %v2436_v46  ;;  %v1204_v43 = vld [vmem:[%s3075_s9] sm:$0x3]  ;;  %v549_v11 = vmul.f32 %v547_v23, %v2857_v29 }
 0x26e   :  { %2218 = vmatprep.subr.bf16.mxu1 %v2217_v5  ;;  %1253 = vrot.lane.b32.xlu1 %v1244_v1, %s2274_s3  ;;  %v1208_v6 = vrot.slane %v1204_v43, %v2526_v21 }
 0x271   :  { %2220 = vmatpush3.bf16.msra.mxu1 %v2217_v5 }
 0x272   :  { %2222 = vmatprep.subr.bf16.mxu1 %v2221_v9  ;;  %1277 = vrot.lane.b32.xlu1 %v1246_v18, %s2275_s8 }
 0x275   :  { %2224 = vmatpush3.bf16.msra.mxu1 %v2221_v9 }
 0x276   :  { %2226 = vmatprep.subr.bf16.mxu1 %v2225_v13  ;;  %1273 = vrot.lane.b32.xlu1 %v1244_v1, %s2275_s8  ;;  %v553_v1 = vrot.slane %v543_v24, %v2533_v25 }
 0x279   :  { %2228 = vmatpush3.bf16.msra.mxu1 %v2225_v13  ;;  %v1214_v13 = vrot.slane %v1204_v43, %v2533_v25 }
 0x27c   :  { %1923 = vmatmul.mubr.f32.vlgmr.msra.gmra.mrb[4].mxu1 %v916_v8  ;;  %v1220_v8 = vand.u32 127, %v36_v19  ;;  %v2246_v19 = vld [vmem:[%s3066_s0] sm:$0xff] }
 0x27e   :  { %vm1221_vm8 = vcmp.lt.s32.totalorder %v1220_v8, 4  ;;  %v548_v8 = vmul.f32 %v547_v23, %v2861_v35 }
 0x2b0   :  { %v1240_v14 = vpop.permute.xlu0 %1239 }
 0x2b1   :  { %v1245_v15 = vsel %vm1222_vm7, %v1240_v14, %v2450_v50 }
 0x2b2   :  { %1255 = vrot.lane.b32.xlu0 %v1245_v15, %s2274_s3 }
 0x2b4   :  { %v1236_v17 = vpop.permute.xlu0 %1235 }
 0x2b5   :  { %v1243_v22 = vsel %vm1222_vm7, %v1236_v17, %v2422_v41 }
 0x2b6   :  { %1251 = vrot.lane.b32.xlu0 %v1243_v22, %s2274_s3 }
 0x2ba   :  { %1275 = vrot.lane.b32.xlu0 %v1245_v15, %s2275_s8 }
 0x2be   :  { %1271 = vrot.lane.b32.xlu0 %v1243_v22, %s2275_s8 }
 0x2dc   :  { %v1258_v28 = vpop.permute.xlu1 %1257 }
 0x2dd   :  { %v1266_v36 = vsel %vm1221_vm8, -inf, %v1258_v28 }
 0x2de   :  { %v1270_v44 = vmax.f32 %v1266_v36, %v2458_v52 }
 0x2e0   :  { %v1254_v40 = vpop.permute.xlu1 %1253 }
 0x2e1   :  { %v1264_v47 = vsel %vm1221_vm8, -inf, %v1254_v40 }
 0x2e2   :  { %v1268_v54 = vmax.f32 %v1264_v47, %v2247_v53 }
 0x324   :  { %v1256_v26 = vpop.permute.xlu0 %1255 }
 0x325   :  { %v1265_v27 = vsel %vm1221_vm8, -inf, %v1256_v26  ;;  %v555_v26 = vadd.f32 %v553_v1, %v549_v11 }
 0x326   :  { %v1269_v31 = vmax.f32 %v1265_v27, %v2450_v50  ;;  %v1278_v50 = vpop.permute.xlu1 %1277  ;;  %v554_v27 = vadd.f32 %v553_v1, %v548_v8 }
 0x327   :  { %v1286_v30 = vmax.f32 %v1270_v44, %v1278_v50  ;;  %v557_v28 = vmax.f32 %v555_v26, 0.0 }
 0x328   :  { %v1252_v41 = vpop.permute.xlu0 %1251 }
 0x329   :  { %v1263_v46 = vsel %vm1221_vm8, -inf, %v1252_v41  ;;  %v1292_v32 = vrot.slane %v1286_v30, 7  ;;  %v556_v41 = vmax.f32 %v554_v27, 0.0 }
 0x32a   :  { %v1267_v3 = vmax.f32 %v1263_v46, %v2246_v19  ;;  %v1274_v58 = vpop.permute.xlu1 %1273 }
 0x32b   :  { %v1284_v39 = vmax.f32 %v1268_v54, %v1274_v58 }
 0x32c   :  { %v1276_v42 = vpop.permute.xlu0 %1275 }
 0x32d   :  { %v1285_v45 = vmax.f32 %v1269_v31, %v1276_v42  ;;  %v1288_v61 = vmax.f32 %v1284_v39, %v1286_v30 }
 0x32f   :  { %v1889_v20 = vpop.f32.mrb[2].mxu1  ;;  %v1291_v49 = vrot.slane %v1285_v45, 7 }
 0x330   :  { %v1092_v38 = vpop.f32.mrb[3].mxu1  ;;  %v1272_v51 = vpop.permute.xlu0 %1271 }
 0x331   :  { %v1296_v55 = vsel %vm528_vm1, -inf, %v1291_v49  ;;  %v1283_v52 = vmax.f32 %v1267_v3, %v1272_v51  ;;  %v1293_v37 = vsel %vm528_vm1, %v1291_v49, %v1292_v32 }
 0x332   :  { %v1297_v33 = vsel %vm2850_vm3, -inf, %v1296_v55  ;;  %v1298_v60 = vsel %vm2846_vm2, -inf, %v1293_v37 }
 0x333   :  { %v1287_v57 = vmax.f32 %v1283_v52, %v1285_v45  ;;  %v1300_v34 = vmax.f32 %v1288_v61, %v1298_v60 }
 0x335   :  { %v1299_v56 = vmax.f32 %v1287_v57, %v1297_v33  ;;  %v1312_v48 = vsel %vm87_vm0, %v1300_v34, 0.0 }
 0x336   :  { %1316 = vst [vmem:[#allocation2 + $0x18] sm:$0xff] %v1312_v48 }
 0x337   :  { %v1311_v59 = vsel %vm87_vm0, %v1299_v56, 0.0 }
 0x338   :  { %1314 = vst [vmem:[#allocation2 + $0x8] sm:$0xff] %v1311_v59 }
 0x34f   :  { %v1924_v62 = vpop.f32.mrb[4].mxu1 }
 0x350   :  { %v1195_v63 = vrot.slane %v1924_v62, 7  ;;  %v1183_v0 = vpop.f32.mrb[5].mxu1 }
 0x351   :  { %v1194_v2 = vrot.slane %v1183_v0, 7 }
 0x353   :  { %v1196_v4 = vsel %vm528_vm1, %v1194_v2, %v1195_v63  ;;  %v1199_v5 = vsel %vm528_vm1, 0.0, %v1194_v2 }
 0x354   :  { %v1200_v7 = vsel %vm2850_vm3, 0.0, %v1199_v5  ;;  %v1201_v9 = vsel %vm2846_vm2, 0.0, %v1196_v4 }
 0x355   :  { %v1202_v10 = vadd.f32 %v1200_v7, %v1092_v38  ;;  %v1203_v12 = vadd.f32 %v1889_v20, %v1201_v9 }
 0x357   :  { %v1209_v14 = vmul.f32 %v1208_v6, %v1202_v10  ;;  %v1210_v15 = vmul.f32 %v1208_v6, %v1203_v12 }
 0x359   :  { %v1215_v16 = vadd.f32 %v1214_v13, %v1209_v14  ;;  %v1216_v17 = vadd.f32 %v1214_v13, %v1210_v15 }
 0x35b   :  { %v1217_v18 = vmax.f32 %v1215_v16, 0.0  ;;  %v1218_v22 = vmax.f32 %v1216_v17, 0.0 }
 0x35d   :  { %1303 = vrot.lane.b32.xlu0 %v1217_v18, %s2273_s30  ;;  %1305 = vrot.lane.b32.xlu1 %v1218_v22, %s2273_s30 }
 0x3cf   :  { %v1304_v31 = vpop.permute.xlu0 %1303  ;;  %v1306_v20 = vpop.permute.xlu1 %1305 }
 0x3d0   :  { %v1309_v36 = vsel %vm87_vm0, %v556_v41, %v1304_v31  ;;  %v1310_v46 = vsel %vm87_vm0, %v557_v28, %v1306_v20 }
 0x3d1   :  { %1313 = vst [vmem:[#allocation2] sm:$0xff] %v1309_v36  ;;  %1315 = vst [vmem:[#allocation2 + $0x10] sm:$0xff] %v1310_v46 }
 0x3d2   :  { %2259 = shalt.err (!%p2256_p4)
}
 0x3d3   :  { %s2260_s1 = scalar_lea.hbm %s3076_s10, 512 }
 0x3d4   :  { %p2261_p5 = scmp.ne.s32.totalorder %s3076_s10, %s2260_s1  ;;  %p2264_p6 = scmp.lt.u32.totalorder %s2260_s1, %s3076_s10 }
 0x3d6   :  { %p2266_p7 = pnand %p2264_p6, %p2261_p5 }
 0x3d8   :  { %2269 = shalt.err (!%p2266_p7)
}
 0x3d9   :  { %s2277_s7 = smov 256   ;;  %s2278_s13 = smov 16  }
 0x3da   :  { %1328 = dma.vmem_to_hbm [thread:$0]  %s1323_s27, 512, %s3076_s10, [#allocation3], %s2277_s7, %s2277_s7, %s2278_s13  }
 0x3db   :  { %2270 = dma.done.wait [#allocation3], 512  }
 0x3dc   :  { %2271 = vsyncadd [#allocation3], 4294966784 }
 0x3dd   :  { %1332 = vsyncpa [#allocation3], 1 }

</bundles_post_ra>
